<compile_context>
chip_gen: v7x
topology: tpu7x:2x2x1
jax: 0.10.0
libtpu: 0.0.40
codegen_flags: <defaults>
</compile_context>

<pallas_src>
import math

import jax
import jax.numpy as jnp
from jax.experimental import pallas as pl
from jax.experimental.pallas import tpu as pltpu

# ---------------------------------------------------------------------------
# Small, module-consistent hyperparameters
# ---------------------------------------------------------------------------
MAX_N = 6          # max_n : vertices per graph
NVT   = 6          # nvt   : number of vertex types
HS    = 32         # hs
NZ    = 8          # nz
TE    = 3          # Te    : encoder propagation rounds
GS    = 2 * HS     # gs = hs * 2
B     = 8          # graphs in the demo batch
GPB   = 4          # graphs packed per grid step (node tile = GPB * MAX_N rows)
START_TYPE, END_TYPE = 0, 1


# ---------------------------------------------------------------------------
# Pallas kernel
# ---------------------------------------------------------------------------
def make_encoder_kernel(Te, hs, compute_dtype):
    def kernel(x_ref, a_ref, deg_ref, upd_ref, pool_ref,
               wfx_ref, bf_ref, wfe_ref, bfec_ref,
               wi_ref, wh_ref, bi_ref, bh_ref,
               wg_ref, bg_ref, wm_ref, w12_ref, b12_ref,
               out_ref):
        f32 = jnp.float32
        cdt = compute_dtype

        def mm(a, b):
            # MXU matmul, f32 accumulation; operands optionally bf16 on v6e/v7x.
            return jnp.dot(a.astype(cdt), b.astype(cdt), preferred_element_type=f32)

        X   = x_ref[...]            # (TN, NVT)  one-hot vertex types (flattened graphs)
        A   = a_ref[...]            # (TN, TN)   block-diag adjacency, A[v,u]=1 iff u->v
        deg = deg_ref[...]          # (TN, 1)    #predecessors of each vertex
        upd = upd_ref[...] > 0.0    # (TN, 1)    vertex has predecessors anywhere in batch

        # vertex init: finit([one_hot(type), Hg=0]) -> only the one-hot columns matter
        H = mm(X, wfx_ref[...]) + bf_ref[...]                       # (TN, HS)

        wfe      = wfe_ref[...]                                     # (2*HS, GS)
        deg_bfec = deg * bfec_ref[...]                              # hoisted, const per round

        # Te synchronous rounds (the reference writes H_tmp and swaps after each round,
        # so the Jacobi update below matches _propagate exactly).
        for t in range(Te):
            hsum = mm(A, H)                                         # sum of predecessor states
            msg  = jnp.concatenate([hsum, deg * H], axis=-1)        # (TN, 2*HS)
            Av   = mm(msg, wfe) + deg_bfec                          # fe(...) summed over preds

            # PyTorch GRUCell with fused r|z|n gates (2 matmuls instead of 6)
            gi = mm(Av, wi_ref[t]) + bi_ref[t]                      # (TN, 3*HS)
            gh = mm(H,  wh_ref[t]) + bh_ref[t]                      # (TN, 3*HS)
            r = jax.nn.sigmoid(gi[:, :hs]       + gh[:, :hs])
            z = jax.nn.sigmoid(gi[:, hs:2 * hs] + gh[:, hs:2 * hs])
            n = jnp.tanh(      gi[:, 2 * hs:]   + r * gh[:, 2 * hs:])
            h_new = (1.0 - z) * n + z * H
            # vertices with no predecessors anywhere in the batch keep their state
            H = jnp.where(upd, h_new, H)

        # gated readout: Hg = sum_v sigmoid(gate(H_v)) * mapper(H_v)  (per graph, via pool)
        gate   = jax.nn.sigmoid(mm(H, wg_ref[...]) + bg_ref[...])   # (TN, GS)
        mapped = mm(H, wm_ref[...])                                 # (TN, GS)
        Hg = jnp.dot(pool_ref[...], gate * mapped,
                     preferred_element_type=f32)                    # (GPB, GS), f32 reduce

        # fused fc1|fc2 -> lane-dense [mu | logvar] output
        out_ref[...] = mm(Hg, w12_ref[...]) + b12_ref[...]          # (GPB, 2*NZ)

    return kernel


# ---------------------------------------------------------------------------
# Host-side weight preparation (transpose / fuse once, outside the kernel)
# ---------------------------------------------------------------------------
def prepare_params(params, compute_dtype=jnp.float32):
    (wfx, bf, wfn, wfe_col, wfv, bfe,
     wir, wiz, win, whr, whz, whn,
     bir, biz, b_in, bhr, bhz, bhn,
     wg, bg, wm, w1, b1, w2, b2) = params
    cdt = compute_dtype
    f32 = jnp.float32

    T2 = lambda w: jnp.transpose(w).astype(cdt)          # (out,in) -> (in,out)
    swap = lambda w: jnp.swapaxes(w, 1, 2)               # (T,out,in) -> (T,in,out)

    wfx_t = T2(wfx)                                                        # (NVT, HS)
    wfe_s = jnp.concatenate([jnp.transpose(wfn), jnp.transpose(wfv)],
                            axis=0).astype(cdt)                            # (2*HS, GS)
    bfe_c = (wfe_col + bfe).astype(f32)                                    # (1, GS)

    wi = jnp.concatenate([swap(wir), swap(wiz), swap(win)], axis=2).astype(cdt)  # (TE,GS,3HS)
    wh = jnp.concatenate([swap(whr), swap(whz), swap(whn)], axis=2).astype(cdt)  # (TE,HS,3HS)
    bi = jnp.concatenate([bir, biz, b_in], axis=2).astype(f32)                   # (TE,1,3HS)
    bh = jnp.concatenate([bhr, bhz, bhn], axis=2).astype(f32)                    # (TE,1,3HS)

    wg_t = T2(wg)                                                          # (HS, GS)
    wm_t = T2(wm)                                                          # (HS, GS)
    w12 = jnp.concatenate([jnp.transpose(w1), jnp.transpose(w2)],
                          axis=1).astype(cdt)                              # (GS, 2*NZ)
    b12 = jnp.concatenate([b1, b2], axis=1).astype(f32)                    # (1, 2*NZ)

    return (wfx_t, bf.astype(f32), wfe_s, bfe_c, wi, wh, bi, bh,
            wg_t, bg.astype(f32), wm_t, w12, b12)


# ---------------------------------------------------------------------------
# Wrapper: pack graphs into node tiles, block-diagonal adjacency, grid over blocks
# ---------------------------------------------------------------------------
def dvae_deepgmg_encode(X, A, params, *, graphs_per_block=GPB,
                        compute_dtype=jnp.float32):
    Bt, N, nvt = X.shape
    pad = (-Bt) % graphs_per_block
    if pad:
        X = jnp.concatenate([X, jnp.zeros((pad, N, nvt), X.dtype)], axis=0)
        A = jnp.concatenate([A, jnp.zeros((pad, N, N), A.dtype)], axis=0)
    Bp = Bt + pad
    nb = Bp // graphs_per_block
    tn = graphs_per_block * N                      # node rows per grid step

    x_flat = X.reshape(nb, tn, nvt)

    # per-grid-step block-diagonal adjacency (one (tn, tn) tile per step)
    A_blocks = A.reshape(nb, graphs_per_block, N, N)
    eye_g = jnp.eye(graphs_per_block, dtype=A.dtype)
    a_bd = jnp.einsum('ngvu,gh->ngvhu', A_blocks, eye_g).reshape(nb, tn, tn)

    deg_full = jnp.sum(A, axis=2)                                  # (Bp, N)
    deg_in = deg_full.reshape(nb, tn)[..., None]                   # (nb, tn, 1)
    # "max_n_nei == 0" semantics over the FULL batch (matches _propagate_to on the whole G list)
    anyp = (jnp.max(deg_full, axis=0) > 0.0).astype(jnp.float32)   # (N,)
    upd = jnp.broadcast_to(anyp, (Bp, N)).reshape(nb, tn)[..., None]

    # per-graph sum pooling as a matmul (avoids rank-3 reshapes in the kernel)
    pool = jnp.repeat(jnp.eye(graphs_per_block, dtype=jnp.float32), N, axis=1)  # (gpb, tn)

    prepared = prepare_params(params, compute_dtype)

    def node_spec(d):
        def idx(i):
            return (i, 0, 0)
        return pl.BlockSpec((None, tn, d), idx)

    def weight_spec(arr):
        shape = tuple(arr.shape)
        nd = len(shape)
        def idx(i, _nd=nd):
            return (0,) * _nd
        return pl.BlockSpec(shape, idx)

    in_specs = ([node_spec(nvt),        # x
                 node_spec(tn),         # block-diag adjacency
                 node_spec(1),          # deg
                 node_spec(1),          # update mask
                 weight_spec(pool)]     # pooling matrix
                + [weight_spec(p) for p in prepared])
    out_spec = pl.BlockSpec((None, graphs_per_block, 2 * NZ), lambda i: (i, 0, 0))

    fn = pl.pallas_call(
        make_encoder_kernel(TE, HS, compute_dtype),
        out_shape=jax.ShapeDtypeStruct((nb, graphs_per_block, 2 * NZ), jnp.float32),
        grid_spec=pltpu.PrefetchScalarGridSpec(
            num_scalar_prefetch=0,
            grid=(nb,),
            in_specs=in_specs,
            out_specs=out_spec,
        ),
        # graph blocks are independent -> shard across v7x's 2 TensorCores
        compiler_params=pltpu.CompilerParams(dimension_semantics=("parallel",)),
    )

    out = fn(x_flat, a_bd, deg_in, upd, pool, *prepared)
    out = out.reshape(nb * graphs_per_block, 2 * NZ)[:Bt]
    mu, logvar = out[:, :NZ], out[:, NZ:]
    # scalar KL term of loss(), reduced on the host (keeps the kernel output lane-dense)
    kld = -0.5 * jnp.sum(1.0 + logvar - mu * mu - jnp.exp(logvar))
    return mu, logvar, kld


# ---------------------------------------------------------------------------
# Pure-JAX reference (mirrors the PyTorch encode() math, batched densely)
# ---------------------------------------------------------------------------
def encode_reference(X, A, params, Te=TE):
    (wfx, bf, wfn, wfe_col, wfv, bfe,
     wir, wiz, win, whr, whz, whn,
     bir, biz, b_in, bhr, bhz, bhn,
     wg, bg, wm, w1, b1, w2, b2) = params
    H = jnp.einsum('bnk,hk->bnh', X, wfx) + bf
    deg = jnp.sum(A, axis=2, keepdims=True)
    anyp = jnp.max(deg, axis=0, keepdims=True) > 0.0
    for t in range(Te):
        hsum = jnp.einsum('bvu,buh->bvh', A, H)
        per_v = jnp.einsum('bnh,gh->bng', H, wfv) + wfe_col + bfe
        Av = jnp.einsum('bnh,gh->bng', hsum, wfn) + deg * per_v
        r = jax.nn.sigmoid(jnp.einsum('bng,hg->bnh', Av, wir[t]) + bir[t]
                           + jnp.einsum('bnh,kh->bnk', H, whr[t]) + bhr[t])
        z = jax.nn.sigmoid(jnp.einsum('bng,hg->bnh', Av, wiz[t]) + biz[t]
                           + jnp.einsum('bnh,kh->bnk', H, whz[t]) + bhz[t])
        n = jnp.tanh(jnp.einsum('bng,hg->bnh', Av, win[t]) + b_in[t]
                     + r * (jnp.einsum('bnh,kh->bnk', H, whn[t]) + bhn[t]))
        h_new = (1.0 - z) * n + z * H
        H = jnp.where(anyp, h_new, H)
    gate = jax.nn.sigmoid(jnp.einsum('bnh,gh->bng', H, wg) + bg)
    mapped = jnp.einsum('bnh,gh->bng', H, wm)
    Hg = jnp.sum(gate * mapped, axis=1)
    mu = Hg @ w1.T + b1
    logvar = Hg @ w2.T + b2
    return mu, logvar


# ---------------------------------------------------------------------------
# Deterministic parameter init (PyTorch default uniform bounds, synthetic values)
# ---------------------------------------------------------------------------
def _uniform(key, shape, bound):
    return jax.random.uniform(key, shape, jnp.float32, minval=-bound, maxval=bound)


def init_params(key):
    keys = iter(jax.random.split(key, 64))

    # finit: Linear(nvt + gs, hs) -- Hg is zero at init time, so only one-hot cols matter
    bnd = 1.0 / math.sqrt(NVT + GS)
    wfx = _uniform(next(keys), (HS, NVT), bnd)
    bf = _uniform(next(keys), (1, HS), bnd)

    # fe: Linear(2*hs + 1, gs), split into [H_nei | edge | H_v] column blocks
    bnd = 1.0 / math.sqrt(2 * HS + 1)
    wfn = _uniform(next(keys), (GS, HS), bnd)
    wfe_col = _uniform(next(keys), (1, GS), bnd)
    wfv = _uniform(next(keys), (GS, HS), bnd)
    bfe = _uniform(next(keys), (1, GS), bnd)

    # grue: Te x GRUCell(gs, hs), split per gate (r, z, n)
    bnd = 1.0 / math.sqrt(HS)
    wir = _uniform(next(keys), (TE, HS, GS), bnd)
    wiz = _uniform(next(keys), (TE, HS, GS), bnd)
    win = _uniform(next(keys), (TE, HS, GS), bnd)
    whr = _uniform(next(keys), (TE, HS, HS), bnd)
    whz = _uniform(next(keys), (TE, HS, HS), bnd)
    whn = _uniform(next(keys), (TE, HS, HS), bnd)
    bir = _uniform(next(keys), (TE, 1, HS), bnd)
    biz = _uniform(next(keys), (TE, 1, HS), bnd)
    b_in = _uniform(next(keys), (TE, 1, HS), bnd)
    bhr = _uniform(next(keys), (TE, 1, HS), bnd)
    bhz = _uniform(next(keys), (TE, 1, HS), bnd)
    bhn = _uniform(next(keys), (TE, 1, HS), bnd)

    # gate: Linear(hs, gs) + Sigmoid ; mapper: Linear(hs, gs, bias=False)
    bnd = 1.0 / math.sqrt(HS)
    wg = _uniform(next(keys), (GS, HS), bnd)
    bg = _uniform(next(keys), (1, GS), bnd)
    wm = _uniform(next(keys), (GS, HS), bnd)

    # fc1 / fc2: Linear(gs, nz)
    bnd = 1.0 / math.sqrt(GS)
    w1 = _uniform(next(keys), (NZ, GS), bnd)
    b1 = _uniform(next(keys), (1, NZ), bnd)
    w2 = _uniform(next(keys), (NZ, GS), bnd)
    b2 = _uniform(next(keys), (1, NZ), bnd)

    return (wfx, bf,
            wfn, wfe_col, wfv, bfe,
            wir, wiz, win, whr, whz, whn,
            bir, biz, b_in, bhr, bhz, bhn,
            wg, bg, wm,
            w1, b1, w2, b2)


# ---------------------------------------------------------------------------
# Deterministic example graphs (random DAGs with max_n vertices each)
# ---------------------------------------------------------------------------
def build_graphs(key, batch):
    kt, ka = jax.random.split(key)
    types = jax.random.randint(kt, (batch, MAX_N), 0, NVT)
    types = types.at[:, 0].set(START_TYPE).at[:, -1].set(END_TYPE)
    X = jax.nn.one_hot(types, NVT, dtype=jnp.float32)                  # (B, N, NVT)
    # directed edge u -> v only for u < v (DAG in index order); A[b, v, u] = 1
    lower = jnp.tril(jnp.ones((MAX_N, MAX_N), jnp.float32), k=-1)
    rand = jax.random.bernoulli(ka, 0.5, (batch, MAX_N, MAX_N)).astype(jnp.float32)
    A = rand * lower
    return X, A


if __name__ == "__main__":
    key = jax.random.PRNGKey(0)
    kp, kg = jax.random.split(key)
    params = init_params(kp)
    X, A = build_graphs(kg, B)

    mu, logvar, kld = dvae_deepgmg_encode(X, A, params,
                                          graphs_per_block=GPB,
                                          compute_dtype=jnp.float32)
    jax.block_until_ready((mu, logvar, kld))

    # sanity check against a pure-JAX reference of the same encoder math
    mu_ref, lv_ref = encode_reference(X, A, params)
    err = max(float(jnp.max(jnp.abs(mu - mu_ref))),
              float(jnp.max(jnp.abs(logvar - lv_ref))))
    assert err < 5e-2, f"kernel/reference mismatch: max abs err = {err}"

    print("KERNEL_OK")
</pallas_src>

<mosaic_0001>
module attributes {stable_mosaic.version = 11 : i64} {
  func.func @kernel(%arg0: i32, %arg1: memref<1x24x6xf32, #tpu.memory_space<vmem>>, %arg2: memref<1x24x24xf32, #tpu.memory_space<vmem>>, %arg3: memref<1x24x1xf32, #tpu.memory_space<vmem>>, %arg4: memref<1x24x1xf32, #tpu.memory_space<vmem>>, %arg5: memref<4x24xf32, #tpu.memory_space<vmem>>, %arg6: memref<6x32xf32, #tpu.memory_space<vmem>>, %arg7: memref<1x32xf32, #tpu.memory_space<vmem>>, %arg8: memref<64x64xf32, #tpu.memory_space<vmem>>, %arg9: memref<1x64xf32, #tpu.memory_space<vmem>>, %arg10: memref<3x64x96xf32, #tpu.memory_space<vmem>>, %arg11: memref<3x32x96xf32, #tpu.memory_space<vmem>>, %arg12: memref<3x1x96xf32, #tpu.memory_space<vmem>>, %arg13: memref<3x1x96xf32, #tpu.memory_space<vmem>>, %arg14: memref<32x64xf32, #tpu.memory_space<vmem>>, %arg15: memref<1x64xf32, #tpu.memory_space<vmem>>, %arg16: memref<32x64xf32, #tpu.memory_space<vmem>>, %arg17: memref<64x16xf32, #tpu.memory_space<vmem>>, %arg18: memref<1x16xf32, #tpu.memory_space<vmem>>, %arg19: memref<1x4x16xf32, #tpu.memory_space<vmem>>) attributes {dimension_semantics = [#tpu.dimension_semantics<parallel>], iteration_bounds = array<i64: 2>, scalar_prefetch = 0 : i64, scratch_operands = 0 : i64, tpu.core_type = #tpu.core_type<tc>, window_params = [{transform_indices = @transform_0, window_bounds = array<i64: 1, 24, 6>}, {transform_indices = @transform_1, window_bounds = array<i64: 1, 24, 24>}, {transform_indices = @transform_2, window_bounds = array<i64: 1, 24, 1>}, {transform_indices = @transform_3, window_bounds = array<i64: 1, 24, 1>}, {pipeline_mode = #tpu.pipeline_mode<synchronous>, transform_indices = @transform_4, window_bounds = array<i64: 4, 24>}, {pipeline_mode = #tpu.pipeline_mode<synchronous>, transform_indices = @transform_5, window_bounds = array<i64: 6, 32>}, {pipeline_mode = #tpu.pipeline_mode<synchronous>, transform_indices = @transform_6, window_bounds = array<i64: 1, 32>}, {pipeline_mode = #tpu.pipeline_mode<synchronous>, transform_indices = @transform_7, window_bounds = array<i64: 64, 64>}, {pipeline_mode = #tpu.pipeline_mode<synchronous>, transform_indices = @transform_8, window_bounds = array<i64: 1, 64>}, {pipeline_mode = #tpu.pipeline_mode<synchronous>, transform_indices = @transform_9, window_bounds = array<i64: 3, 64, 96>}, {pipeline_mode = #tpu.pipeline_mode<synchronous>, transform_indices = @transform_10, window_bounds = array<i64: 3, 32, 96>}, {pipeline_mode = #tpu.pipeline_mode<synchronous>, transform_indices = @transform_11, window_bounds = array<i64: 3, 1, 96>}, {pipeline_mode = #tpu.pipeline_mode<synchronous>, transform_indices = @transform_12, window_bounds = array<i64: 3, 1, 96>}, {pipeline_mode = #tpu.pipeline_mode<synchronous>, transform_indices = @transform_13, window_bounds = array<i64: 32, 64>}, {pipeline_mode = #tpu.pipeline_mode<synchronous>, transform_indices = @transform_14, window_bounds = array<i64: 1, 64>}, {pipeline_mode = #tpu.pipeline_mode<synchronous>, transform_indices = @transform_15, window_bounds = array<i64: 32, 64>}, {pipeline_mode = #tpu.pipeline_mode<synchronous>, transform_indices = @transform_16, window_bounds = array<i64: 64, 16>}, {pipeline_mode = #tpu.pipeline_mode<synchronous>, transform_indices = @transform_17, window_bounds = array<i64: 1, 16>}, {transform_indices = @transform_18, window_bounds = array<i64: 1, 4, 16>}]} {
    %c0 = arith.constant 0 : index
    %c0_0 = arith.constant 0 : index
    %c0_1 = arith.constant 0 : index
    %0 = vector.load %arg1[%c0, %c0_0, %c0_1] : memref<1x24x6xf32, #tpu.memory_space<vmem>>, vector<1x24x6xf32>
    %1 = vector.shape_cast %0 : vector<1x24x6xf32> to vector<24x6xf32>
    %c0_2 = arith.constant 0 : index
    %c0_3 = arith.constant 0 : index
    %c0_4 = arith.constant 0 : index
    %2 = vector.load %arg2[%c0_2, %c0_3, %c0_4] : memref<1x24x24xf32, #tpu.memory_space<vmem>>, vector<1x24x24xf32>
    %3 = vector.shape_cast %2 : vector<1x24x24xf32> to vector<24x24xf32>
    %c0_5 = arith.constant 0 : index
    %c0_6 = arith.constant 0 : index
    %c0_7 = arith.constant 0 : index
    %4 = vector.load %arg3[%c0_5, %c0_6, %c0_7] : memref<1x24x1xf32, #tpu.memory_space<vmem>>, vector<1x24x1xf32>
    %5 = vector.shape_cast %4 : vector<1x24x1xf32> to vector<24x1xf32>
    %c0_8 = arith.constant 0 : index
    %c0_9 = arith.constant 0 : index
    %c0_10 = arith.constant 0 : index
    %6 = vector.load %arg4[%c0_8, %c0_9, %c0_10] : memref<1x24x1xf32, #tpu.memory_space<vmem>>, vector<1x24x1xf32>
    %7 = vector.shape_cast %6 : vector<1x24x1xf32> to vector<24x1xf32>
    %cst = arith.constant 0.000000e+00 : f32
    %8 = vector.broadcast %cst : f32 to vector<24x1xf32>
    %9 = arith.cmpf ogt, %7, %8 : vector<24x1xf32>
    %c0_11 = arith.constant 0 : index
    %c0_12 = arith.constant 0 : index
    %10 = vector.load %arg6[%c0_11, %c0_12] : memref<6x32xf32, #tpu.memory_space<vmem>>, vector<6x32xf32>
    %cst_13 = arith.constant dense<0.000000e+00> : vector<24x32xf32>
    %11 = tpu.matmul %1, %10, %cst_13 {dimension_numbers = #tpu.dot_dimension_numbers<[1], [0], [0], [1], [0, 0, 1, 1], [], []>} : vector<24x6xf32>, vector<6x32xf32>, vector<24x32xf32> -> vector<24x32xf32>
    %c0_14 = arith.constant 0 : index
    %c0_15 = arith.constant 0 : index
    %12 = vector.load %arg7[%c0_14, %c0_15] : memref<1x32xf32, #tpu.memory_space<vmem>>, vector<1x32xf32>
    %13 = vector.broadcast %12 : vector<1x32xf32> to vector<24x32xf32>
    %14 = arith.addf %11, %13 : vector<24x32xf32>
    %c0_16 = arith.constant 0 : index
    %c0_17 = arith.constant 0 : index
    %15 = vector.load %arg8[%c0_16, %c0_17] : memref<64x64xf32, #tpu.memory_space<vmem>>, vector<64x64xf32>
    %c0_18 = arith.constant 0 : index
    %c0_19 = arith.constant 0 : index
    %16 = vector.load %arg9[%c0_18, %c0_19] : memref<1x64xf32, #tpu.memory_space<vmem>>, vector<1x64xf32>
    %17 = vector.broadcast %5 : vector<24x1xf32> to vector<24x64xf32>
    %18 = vector.broadcast %16 : vector<1x64xf32> to vector<24x64xf32>
    %19 = arith.mulf %17, %18 : vector<24x64xf32>
    %cst_20 = arith.constant dense<0.000000e+00> : vector<24x32xf32>
    %20 = tpu.matmul %3, %14, %cst_20 {dimension_numbers = #tpu.dot_dimension_numbers<[1], [0], [0], [1], [0, 0, 1, 1], [], []>} : vector<24x24xf32>, vector<24x32xf32>, vector<24x32xf32> -> vector<24x32xf32>
    %21 = vector.broadcast %5 : vector<24x1xf32> to vector<24x32xf32>
    %22 = arith.mulf %21, %14 : vector<24x32xf32>
    %23 = tpu.concatenate %20, %22 in 1 : vector<24x32xf32>, vector<24x32xf32> -> vector<24x64xf32>
    %cst_21 = arith.constant dense<0.000000e+00> : vector<24x64xf32>
    %24 = tpu.matmul %23, %15, %cst_21 {dimension_numbers = #tpu.dot_dimension_numbers<[1], [0], [0], [1], [0, 0, 1, 1], [], []>} : vector<24x64xf32>, vector<64x64xf32>, vector<24x64xf32> -> vector<24x64xf32>
    %25 = arith.addf %24, %19 : vector<24x64xf32>
    %c0_22 = arith.constant 0 : index
    %c0_23 = arith.constant 0 : index
    %c0_24 = arith.constant 0 : index
    %26 = vector.load %arg10[%c0_22, %c0_23, %c0_24] : memref<3x64x96xf32, #tpu.memory_space<vmem>>, vector<1x64x96xf32>
    %27 = vector.shape_cast %26 : vector<1x64x96xf32> to vector<64x96xf32>
    %cst_25 = arith.constant dense<0.000000e+00> : vector<24x96xf32>
    %28 = tpu.matmul %25, %27, %cst_25 {dimension_numbers = #tpu.dot_dimension_numbers<[1], [0], [0], [1], [0, 0, 1, 1], [], []>} : vector<24x64xf32>, vector<64x96xf32>, vector<24x96xf32> -> vector<24x96xf32>
    %c0_26 = arith.constant 0 : index
    %c0_27 = arith.constant 0 : index
    %c0_28 = arith.constant 0 : index
    %29 = vector.load %arg12[%c0_26, %c0_27, %c0_28] : memref<3x1x96xf32, #tpu.memory_space<vmem>>, vector<1x1x96xf32>
    %30 = vector.shape_cast %29 : vector<1x1x96xf32> to vector<1x96xf32>
    %31 = vector.broadcast %30 : vector<1x96xf32> to vector<24x96xf32>
    %32 = arith.addf %28, %31 : vector<24x96xf32>
    %c0_29 = arith.constant 0 : index
    %c0_30 = arith.constant 0 : index
    %c0_31 = arith.constant 0 : index
    %33 = vector.load %arg11[%c0_29, %c0_30, %c0_31] : memref<3x32x96xf32, #tpu.memory_space<vmem>>, vector<1x32x96xf32>
    %34 = vector.shape_cast %33 : vector<1x32x96xf32> to vector<32x96xf32>
    %cst_32 = arith.constant dense<0.000000e+00> : vector<24x96xf32>
    %35 = tpu.matmul %14, %34, %cst_32 {dimension_numbers = #tpu.dot_dimension_numbers<[1], [0], [0], [1], [0, 0, 1, 1], [], []>} : vector<24x32xf32>, vector<32x96xf32>, vector<24x96xf32> -> vector<24x96xf32>
    %c0_33 = arith.constant 0 : index
    %c0_34 = arith.constant 0 : index
    %c0_35 = arith.constant 0 : index
    %36 = vector.load %arg13[%c0_33, %c0_34, %c0_35] : memref<3x1x96xf32, #tpu.memory_space<vmem>>, vector<1x1x96xf32>
    %37 = vector.shape_cast %36 : vector<1x1x96xf32> to vector<1x96xf32>
    %38 = vector.broadcast %37 : vector<1x96xf32> to vector<24x96xf32>
    %39 = arith.addf %35, %38 : vector<24x96xf32>
    %40 = vector.extract_strided_slice %32 {offsets = [0, 0], sizes = [24, 32], strides = [1, 1]} : vector<24x96xf32> to vector<24x32xf32>
    %41 = vector.extract_strided_slice %39 {offsets = [0, 0], sizes = [24, 32], strides = [1, 1]} : vector<24x96xf32> to vector<24x32xf32>
    %42 = arith.addf %40, %41 : vector<24x32xf32>
    %43 = arith.negf %42 : vector<24x32xf32>
    %44 = math.exp %43 : vector<24x32xf32>
    %cst_36 = arith.constant 1.000000e+00 : f32
    %45 = vector.broadcast %cst_36 : f32 to vector<24x32xf32>
    %46 = arith.addf %45, %44 : vector<24x32xf32>
    %47 = arith.divf %45, %46 : vector<24x32xf32>
    %48 = vector.extract_strided_slice %32 {offsets = [0, 32], sizes = [24, 32], strides = [1, 1]} : vector<24x96xf32> to vector<24x32xf32>
    %49 = vector.extract_strided_slice %39 {offsets = [0, 32], sizes = [24, 32], strides = [1, 1]} : vector<24x96xf32> to vector<24x32xf32>
    %50 = arith.addf %48, %49 : vector<24x32xf32>
    %51 = arith.negf %50 : vector<24x32xf32>
    %52 = math.exp %51 : vector<24x32xf32>
    %cst_37 = arith.constant 1.000000e+00 : f32
    %53 = vector.broadcast %cst_37 : f32 to vector<24x32xf32>
    %54 = arith.addf %53, %52 : vector<24x32xf32>
    %55 = arith.divf %53, %54 : vector<24x32xf32>
    %56 = vector.extract_strided_slice %32 {offsets = [0, 64], sizes = [24, 32], strides = [1, 1]} : vector<24x96xf32> to vector<24x32xf32>
    %57 = vector.extract_strided_slice %39 {offsets = [0, 64], sizes = [24, 32], strides = [1, 1]} : vector<24x96xf32> to vector<24x32xf32>
    %58 = arith.mulf %47, %57 : vector<24x32xf32>
    %59 = arith.addf %56, %58 : vector<24x32xf32>
    %60 = math.tanh %59 : vector<24x32xf32>
    %cst_38 = arith.constant 1.000000e+00 : f32
    %61 = vector.broadcast %cst_38 : f32 to vector<24x32xf32>
    %62 = arith.subf %61, %55 : vector<24x32xf32>
    %63 = arith.mulf %62, %60 : vector<24x32xf32>
    %64 = arith.mulf %55, %14 : vector<24x32xf32>
    %65 = arith.addf %63, %64 : vector<24x32xf32>
    %66 = vector.shape_cast %9 : vector<24x1xi1> to vector<24x1xi1>
    %67 = vector.broadcast %66 : vector<24x1xi1> to vector<24x32xi1>
    %68 = arith.select %67, %65, %14 : vector<24x32xi1>, vector<24x32xf32>
    %cst_39 = arith.constant dense<0.000000e+00> : vector<24x32xf32>
    %69 = tpu.matmul %3, %68, %cst_39 {dimension_numbers = #tpu.dot_dimension_numbers<[1], [0], [0], [1], [0, 0, 1, 1], [], []>} : vector<24x24xf32>, vector<24x32xf32>, vector<24x32xf32> -> vector<24x32xf32>
    %70 = vector.broadcast %5 : vector<24x1xf32> to vector<24x32xf32>
    %71 = arith.mulf %70, %68 : vector<24x32xf32>
    %72 = tpu.concatenate %69, %71 in 1 : vector<24x32xf32>, vector<24x32xf32> -> vector<24x64xf32>
    %cst_40 = arith.constant dense<0.000000e+00> : vector<24x64xf32>
    %73 = tpu.matmul %72, %15, %cst_40 {dimension_numbers = #tpu.dot_dimension_numbers<[1], [0], [0], [1], [0, 0, 1, 1], [], []>} : vector<24x64xf32>, vector<64x64xf32>, vector<24x64xf32> -> vector<24x64xf32>
    %74 = arith.addf %73, %19 : vector<24x64xf32>
    %c1 = arith.constant 1 : index
    %c0_41 = arith.constant 0 : index
    %c0_42 = arith.constant 0 : index
    %75 = vector.load %arg10[%c1, %c0_41, %c0_42] : memref<3x64x96xf32, #tpu.memory_space<vmem>>, vector<1x64x96xf32>
    %76 = vector.shape_cast %75 : vector<1x64x96xf32> to vector<64x96xf32>
    %cst_43 = arith.constant dense<0.000000e+00> : vector<24x96xf32>
    %77 = tpu.matmul %74, %76, %cst_43 {dimension_numbers = #tpu.dot_dimension_numbers<[1], [0], [0], [1], [0, 0, 1, 1], [], []>} : vector<24x64xf32>, vector<64x96xf32>, vector<24x96xf32> -> vector<24x96xf32>
    %c1_44 = arith.constant 1 : index
    %c0_45 = arith.constant 0 : index
    %c0_46 = arith.constant 0 : index
    %78 = vector.load %arg12[%c1_44, %c0_45, %c0_46] : memref<3x1x96xf32, #tpu.memory_space<vmem>>, vector<1x1x96xf32>
    %79 = vector.shape_cast %78 : vector<1x1x96xf32> to vector<1x96xf32>
    %80 = vector.broadcast %79 : vector<1x96xf32> to vector<24x96xf32>
    %81 = arith.addf %77, %80 : vector<24x96xf32>
    %c1_47 = arith.constant 1 : index
    %c0_48 = arith.constant 0 : index
    %c0_49 = arith.constant 0 : index
    %82 = vector.load %arg11[%c1_47, %c0_48, %c0_49] : memref<3x32x96xf32, #tpu.memory_space<vmem>>, vector<1x32x96xf32>
    %83 = vector.shape_cast %82 : vector<1x32x96xf32> to vector<32x96xf32>
    %cst_50 = arith.constant dense<0.000000e+00> : vector<24x96xf32>
    %84 = tpu.matmul %68, %83, %cst_50 {dimension_numbers = #tpu.dot_dimension_numbers<[1], [0], [0], [1], [0, 0, 1, 1], [], []>} : vector<24x32xf32>, vector<32x96xf32>, vector<24x96xf32> -> vector<24x96xf32>
    %c1_51 = arith.constant 1 : index
    %c0_52 = arith.constant 0 : index
    %c0_53 = arith.constant 0 : index
    %85 = vector.load %arg13[%c1_51, %c0_52, %c0_53] : memref<3x1x96xf32, #tpu.memory_space<vmem>>, vector<1x1x96xf32>
    %86 = vector.shape_cast %85 : vector<1x1x96xf32> to vector<1x96xf32>
    %87 = vector.broadcast %86 : vector<1x96xf32> to vector<24x96xf32>
    %88 = arith.addf %84, %87 : vector<24x96xf32>
    %89 = vector.extract_strided_slice %81 {offsets = [0, 0], sizes = [24, 32], strides = [1, 1]} : vector<24x96xf32> to vector<24x32xf32>
    %90 = vector.extract_strided_slice %88 {offsets = [0, 0], sizes = [24, 32], strides = [1, 1]} : vector<24x96xf32> to vector<24x32xf32>
    %91 = arith.addf %89, %90 : vector<24x32xf32>
    %92 = arith.negf %91 : vector<24x32xf32>
    %93 = math.exp %92 : vector<24x32xf32>
    %cst_54 = arith.constant 1.000000e+00 : f32
    %94 = vector.broadcast %cst_54 : f32 to vector<24x32xf32>
    %95 = arith.addf %94, %93 : vector<24x32xf32>
    %96 = arith.divf %94, %95 : vector<24x32xf32>
    %97 = vector.extract_strided_slice %81 {offsets = [0, 32], sizes = [24, 32], strides = [1, 1]} : vector<24x96xf32> to vector<24x32xf32>
    %98 = vector.extract_strided_slice %88 {offsets = [0, 32], sizes = [24, 32], strides = [1, 1]} : vector<24x96xf32> to vector<24x32xf32>
    %99 = arith.addf %97, %98 : vector<24x32xf32>
    %100 = arith.negf %99 : vector<24x32xf32>
    %101 = math.exp %100 : vector<24x32xf32>
    %cst_55 = arith.constant 1.000000e+00 : f32
    %102 = vector.broadcast %cst_55 : f32 to vector<24x32xf32>
    %103 = arith.addf %102, %101 : vector<24x32xf32>
    %104 = arith.divf %102, %103 : vector<24x32xf32>
    %105 = vector.extract_strided_slice %81 {offsets = [0, 64], sizes = [24, 32], strides = [1, 1]} : vector<24x96xf32> to vector<24x32xf32>
    %106 = vector.extract_strided_slice %88 {offsets = [0, 64], sizes = [24, 32], strides = [1, 1]} : vector<24x96xf32> to vector<24x32xf32>
    %107 = arith.mulf %96, %106 : vector<24x32xf32>
    %108 = arith.addf %105, %107 : vector<24x32xf32>
    %109 = math.tanh %108 : vector<24x32xf32>
    %cst_56 = arith.constant 1.000000e+00 : f32
    %110 = vector.broadcast %cst_56 : f32 to vector<24x32xf32>
    %111 = arith.subf %110, %104 : vector<24x32xf32>
    %112 = arith.mulf %111, %109 : vector<24x32xf32>
    %113 = arith.mulf %104, %68 : vector<24x32xf32>
    %114 = arith.addf %112, %113 : vector<24x32xf32>
    %115 = vector.shape_cast %9 : vector<24x1xi1> to vector<24x1xi1>
    %116 = vector.broadcast %115 : vector<24x1xi1> to vector<24x32xi1>
    %117 = arith.select %116, %114, %68 : vector<24x32xi1>, vector<24x32xf32>
    %cst_57 = arith.constant dense<0.000000e+00> : vector<24x32xf32>
    %118 = tpu.matmul %3, %117, %cst_57 {dimension_numbers = #tpu.dot_dimension_numbers<[1], [0], [0], [1], [0, 0, 1, 1], [], []>} : vector<24x24xf32>, vector<24x32xf32>, vector<24x32xf32> -> vector<24x32xf32>
    %119 = vector.broadcast %5 : vector<24x1xf32> to vector<24x32xf32>
    %120 = arith.mulf %119, %117 : vector<24x32xf32>
    %121 = tpu.concatenate %118, %120 in 1 : vector<24x32xf32>, vector<24x32xf32> -> vector<24x64xf32>
    %cst_58 = arith.constant dense<0.000000e+00> : vector<24x64xf32>
    %122 = tpu.matmul %121, %15, %cst_58 {dimension_numbers = #tpu.dot_dimension_numbers<[1], [0], [0], [1], [0, 0, 1, 1], [], []>} : vector<24x64xf32>, vector<64x64xf32>, vector<24x64xf32> -> vector<24x64xf32>
    %123 = arith.addf %122, %19 : vector<24x64xf32>
    %c2 = arith.constant 2 : index
    %c0_59 = arith.constant 0 : index
    %c0_60 = arith.constant 0 : index
    %124 = vector.load %arg10[%c2, %c0_59, %c0_60] : memref<3x64x96xf32, #tpu.memory_space<vmem>>, vector<1x64x96xf32>
    %125 = vector.shape_cast %124 : vector<1x64x96xf32> to vector<64x96xf32>
    %cst_61 = arith.constant dense<0.000000e+00> : vector<24x96xf32>
    %126 = tpu.matmul %123, %125, %cst_61 {dimension_numbers = #tpu.dot_dimension_numbers<[1], [0], [0], [1], [0, 0, 1, 1], [], []>} : vector<24x64xf32>, vector<64x96xf32>, vector<24x96xf32> -> vector<24x96xf32>
    %c2_62 = arith.constant 2 : index
    %c0_63 = arith.constant 0 : index
    %c0_64 = arith.constant 0 : index
    %127 = vector.load %arg12[%c2_62, %c0_63, %c0_64] : memref<3x1x96xf32, #tpu.memory_space<vmem>>, vector<1x1x96xf32>
    %128 = vector.shape_cast %127 : vector<1x1x96xf32> to vector<1x96xf32>
    %129 = vector.broadcast %128 : vector<1x96xf32> to vector<24x96xf32>
    %130 = arith.addf %126, %129 : vector<24x96xf32>
    %c2_65 = arith.constant 2 : index
    %c0_66 = arith.constant 0 : index
    %c0_67 = arith.constant 0 : index
    %131 = vector.load %arg11[%c2_65, %c0_66, %c0_67] : memref<3x32x96xf32, #tpu.memory_space<vmem>>, vector<1x32x96xf32>
    %132 = vector.shape_cast %131 : vector<1x32x96xf32> to vector<32x96xf32>
    %cst_68 = arith.constant dense<0.000000e+00> : vector<24x96xf32>
    %133 = tpu.matmul %117, %132, %cst_68 {dimension_numbers = #tpu.dot_dimension_numbers<[1], [0], [0], [1], [0, 0, 1, 1], [], []>} : vector<24x32xf32>, vector<32x96xf32>, vector<24x96xf32> -> vector<24x96xf32>
    %c2_69 = arith.constant 2 : index
    %c0_70 = arith.constant 0 : index
    %c0_71 = arith.constant 0 : index
    %134 = vector.load %arg13[%c2_69, %c0_70, %c0_71] : memref<3x1x96xf32, #tpu.memory_space<vmem>>, vector<1x1x96xf32>
    %135 = vector.shape_cast %134 : vector<1x1x96xf32> to vector<1x96xf32>
    %136 = vector.broadcast %135 : vector<1x96xf32> to vector<24x96xf32>
    %137 = arith.addf %133, %136 : vector<24x96xf32>
    %138 = vector.extract_strided_slice %130 {offsets = [0, 0], sizes = [24, 32], strides = [1, 1]} : vector<24x96xf32> to vector<24x32xf32>
    %139 = vector.extract_strided_slice %137 {offsets = [0, 0], sizes = [24, 32], strides = [1, 1]} : vector<24x96xf32> to vector<24x32xf32>
    %140 = arith.addf %138, %139 : vector<24x32xf32>
    %141 = arith.negf %140 : vector<24x32xf32>
    %142 = math.exp %141 : vector<24x32xf32>
    %cst_72 = arith.constant 1.000000e+00 : f32
    %143 = vector.broadcast %cst_72 : f32 to vector<24x32xf32>
    %144 = arith.addf %143, %142 : vector<24x32xf32>
    %145 = arith.divf %143, %144 : vector<24x32xf32>
    %146 = vector.extract_strided_slice %130 {offsets = [0, 32], sizes = [24, 32], strides = [1, 1]} : vector<24x96xf32> to vector<24x32xf32>
    %147 = vector.extract_strided_slice %137 {offsets = [0, 32], sizes = [24, 32], strides = [1, 1]} : vector<24x96xf32> to vector<24x32xf32>
    %148 = arith.addf %146, %147 : vector<24x32xf32>
    %149 = arith.negf %148 : vector<24x32xf32>
    %150 = math.exp %149 : vector<24x32xf32>
    %cst_73 = arith.constant 1.000000e+00 : f32
    %151 = vector.broadcast %cst_73 : f32 to vector<24x32xf32>
    %152 = arith.addf %151, %150 : vector<24x32xf32>
    %153 = arith.divf %151, %152 : vector<24x32xf32>
    %154 = vector.extract_strided_slice %130 {offsets = [0, 64], sizes = [24, 32], strides = [1, 1]} : vector<24x96xf32> to vector<24x32xf32>
    %155 = vector.extract_strided_slice %137 {offsets = [0, 64], sizes = [24, 32], strides = [1, 1]} : vector<24x96xf32> to vector<24x32xf32>
    %156 = arith.mulf %145, %155 : vector<24x32xf32>
    %157 = arith.addf %154, %156 : vector<24x32xf32>
    %158 = math.tanh %157 : vector<24x32xf32>
    %cst_74 = arith.constant 1.000000e+00 : f32
    %159 = vector.broadcast %cst_74 : f32 to vector<24x32xf32>
    %160 = arith.subf %159, %153 : vector<24x32xf32>
    %161 = arith.mulf %160, %158 : vector<24x32xf32>
    %162 = arith.mulf %153, %117 : vector<24x32xf32>
    %163 = arith.addf %161, %162 : vector<24x32xf32>
    %164 = vector.shape_cast %9 : vector<24x1xi1> to vector<24x1xi1>
    %165 = vector.broadcast %164 : vector<24x1xi1> to vector<24x32xi1>
    %166 = arith.select %165, %163, %117 : vector<24x32xi1>, vector<24x32xf32>
    %c0_75 = arith.constant 0 : index
    %c0_76 = arith.constant 0 : index
    %167 = vector.load %arg14[%c0_75, %c0_76] : memref<32x64xf32, #tpu.memory_space<vmem>>, vector<32x64xf32>
    %cst_77 = arith.constant dense<0.000000e+00> : vector<24x64xf32>
    %168 = tpu.matmul %166, %167, %cst_77 {dimension_numbers = #tpu.dot_dimension_numbers<[1], [0], [0], [1], [0, 0, 1, 1], [], []>} : vector<24x32xf32>, vector<32x64xf32>, vector<24x64xf32> -> vector<24x64xf32>
    %c0_78 = arith.constant 0 : index
    %c0_79 = arith.constant 0 : index
    %169 = vector.load %arg15[%c0_78, %c0_79] : memref<1x64xf32, #tpu.memory_space<vmem>>, vector<1x64xf32>
    %170 = vector.broadcast %169 : vector<1x64xf32> to vector<24x64xf32>
    %171 = arith.addf %168, %170 : vector<24x64xf32>
    %172 = arith.negf %171 : vector<24x64xf32>
    %173 = math.exp %172 : vector<24x64xf32>
    %cst_80 = arith.constant 1.000000e+00 : f32
    %174 = vector.broadcast %cst_80 : f32 to vector<24x64xf32>
    %175 = arith.addf %174, %173 : vector<24x64xf32>
    %176 = arith.divf %174, %175 : vector<24x64xf32>
    %c0_81 = arith.constant 0 : index
    %c0_82 = arith.constant 0 : index
    %177 = vector.load %arg16[%c0_81, %c0_82] : memref<32x64xf32, #tpu.memory_space<vmem>>, vector<32x64xf32>
    %cst_83 = arith.constant dense<0.000000e+00> : vector<24x64xf32>
    %178 = tpu.matmul %166, %177, %cst_83 {dimension_numbers = #tpu.dot_dimension_numbers<[1], [0], [0], [1], [0, 0, 1, 1], [], []>} : vector<24x32xf32>, vector<32x64xf32>, vector<24x64xf32> -> vector<24x64xf32>
    %c0_84 = arith.constant 0 : index
    %c0_85 = arith.constant 0 : index
    %179 = vector.load %arg5[%c0_84, %c0_85] : memref<4x24xf32, #tpu.memory_space<vmem>>, vector<4x24xf32>
    %180 = arith.mulf %176, %178 : vector<24x64xf32>
    %cst_86 = arith.constant dense<0.000000e+00> : vector<4x64xf32>
    %181 = tpu.matmul %179, %180, %cst_86 {dimension_numbers = #tpu.dot_dimension_numbers<[1], [0], [0], [1], [0, 0, 1, 1], [], []>} : vector<4x24xf32>, vector<24x64xf32>, vector<4x64xf32> -> vector<4x64xf32>
    %c0_87 = arith.constant 0 : index
    %c0_88 = arith.constant 0 : index
    %182 = vector.load %arg17[%c0_87, %c0_88] : memref<64x16xf32, #tpu.memory_space<vmem>>, vector<64x16xf32>
    %cst_89 = arith.constant dense<0.000000e+00> : vector<4x16xf32>
    %183 = tpu.matmul %181, %182, %cst_89 {dimension_numbers = #tpu.dot_dimension_numbers<[1], [0], [0], [1], [0, 0, 1, 1], [], []>} : vector<4x64xf32>, vector<64x16xf32>, vector<4x16xf32> -> vector<4x16xf32>
    %c0_90 = arith.constant 0 : index
    %c0_91 = arith.constant 0 : index
    %184 = vector.load %arg18[%c0_90, %c0_91] : memref<1x16xf32, #tpu.memory_space<vmem>>, vector<1x16xf32>
    %185 = vector.broadcast %184 : vector<1x16xf32> to vector<4x16xf32>
    %186 = arith.addf %183, %185 : vector<4x16xf32>
    %c0_92 = arith.constant 0 : index
    %c0_93 = arith.constant 0 : index
    %c0_94 = arith.constant 0 : index
    %187 = vector.load %arg19[%c0_92, %c0_93, %c0_94] : memref<1x4x16xf32, #tpu.memory_space<vmem>>, vector<1x4x16xf32>
    %188 = vector.shape_cast %187 : vector<1x4x16xf32> to vector<4x16xf32>
    %189 = vector.shape_cast %186 : vector<4x16xf32> to vector<1x4x16xf32>
    tpu.vector_store %arg19[%c0_92, %c0_93, %c0_94], %189 {strides = array<i32>} : memref<1x4x16xf32, #tpu.memory_space<vmem>>, vector<1x4x16xf32>,
    return
  }
  func.func @transform_0(%arg0: i32) -> (i32, i32, i32) {
    %c0_i32 = arith.constant 0 : i32
    %c0_i32_0 = arith.constant 0 : i32
    %c0_i32_1 = arith.constant 0 : i32
    return %arg0, %c0_i32, %c0_i32_0 : i32, i32, i32
  }
  func.func @transform_1(%arg0: i32) -> (i32, i32, i32) {
    %c0_i32 = arith.constant 0 : i32
    %c0_i32_0 = arith.constant 0 : i32
    %c0_i32_1 = arith.constant 0 : i32
    return %arg0, %c0_i32, %c0_i32_0 : i32, i32, i32
  }
  func.func @transform_2(%arg0: i32) -> (i32, i32, i32) {
    %c0_i32 = arith.constant 0 : i32
    %c0_i32_0 = arith.constant 0 : i32
    %c0_i32_1 = arith.constant 0 : i32
    return %arg0, %c0_i32, %c0_i32_0 : i32, i32, i32
  }
  func.func @transform_3(%arg0: i32) -> (i32, i32, i32) {
    %c0_i32 = arith.constant 0 : i32
    %c0_i32_0 = arith.constant 0 : i32
    %c0_i32_1 = arith.constant 0 : i32
    return %arg0, %c0_i32, %c0_i32_0 : i32, i32, i32
  }
  func.func @transform_4(%arg0: i32) -> (i32, i32) {
    %c0_i32 = arith.constant 0 : i32
    %c0_i32_0 = arith.constant 0 : i32
    %c0_i32_1 = arith.constant 0 : i32
    return %c0_i32, %c0_i32_0 : i32, i32
  }
  func.func @transform_5(%arg0: i32) -> (i32, i32) {
    %c0_i32 = arith.constant 0 : i32
    %c0_i32_0 = arith.constant 0 : i32
    %c0_i32_1 = arith.constant 0 : i32
    return %c0_i32, %c0_i32_0 : i32, i32
  }
  func.func @transform_6(%arg0: i32) -> (i32, i32) {
    %c0_i32 = arith.constant 0 : i32
    %c0_i32_0 = arith.constant 0 : i32
    %c0_i32_1 = arith.constant 0 : i32
    return %c0_i32, %c0_i32_0 : i32, i32
  }
  func.func @transform_7(%arg0: i32) -> (i32, i32) {
    %c0_i32 = arith.constant 0 : i32
    %c0_i32_0 = arith.constant 0 : i32
    %c0_i32_1 = arith.constant 0 : i32
    return %c0_i32, %c0_i32_0 : i32, i32
  }
  func.func @transform_8(%arg0: i32) -> (i32, i32) {
    %c0_i32 = arith.constant 0 : i32
    %c0_i32_0 = arith.constant 0 : i32
    %c0_i32_1 = arith.constant 0 : i32
    return %c0_i32, %c0_i32_0 : i32, i32
  }
  func.func @transform_9(%arg0: i32) -> (i32, i32, i32) {
    %c0_i32 = arith.constant 0 : i32
    %c0_i32_0 = arith.constant 0 : i32
    %c0_i32_1 = arith.constant 0 : i32
    %c0_i32_2 = arith.constant 0 : i32
    return %c0_i32, %c0_i32_0, %c0_i32_1 : i32, i32, i32
  }
  func.func @transform_10(%arg0: i32) -> (i32, i32, i32) {
    %c0_i32 = arith.constant 0 : i32
    %c0_i32_0 = arith.constant 0 : i32
    %c0_i32_1 = arith.constant 0 : i32
    %c0_i32_2 = arith.constant 0 : i32
    return %c0_i32, %c0_i32_0, %c0_i32_1 : i32, i32, i32
  }
  func.func @transform_11(%arg0: i32) -> (i32, i32, i32) {
    %c0_i32 = arith.constant 0 : i32
    %c0_i32_0 = arith.constant 0 : i32
    %c0_i32_1 = arith.constant 0 : i32
    %c0_i32_2 = arith.constant 0 : i32
    return %c0_i32, %c0_i32_0, %c0_i32_1 : i32, i32, i32
  }
  func.func @transform_12(%arg0: i32) -> (i32, i32, i32) {
    %c0_i32 = arith.constant 0 : i32
    %c0_i32_0 = arith.constant 0 : i32
    %c0_i32_1 = arith.constant 0 : i32
    %c0_i32_2 = arith.constant 0 : i32
    return %c0_i32, %c0_i32_0, %c0_i32_1 : i32, i32, i32
  }
  func.func @transform_13(%arg0: i32) -> (i32, i32) {
    %c0_i32 = arith.constant 0 : i32
    %c0_i32_0 = arith.constant 0 : i32
    %c0_i32_1 = arith.constant 0 : i32
    return %c0_i32, %c0_i32_0 : i32, i32
  }
  func.func @transform_14(%arg0: i32) -> (i32, i32) {
    %c0_i32 = arith.constant 0 : i32
    %c0_i32_0 = arith.constant 0 : i32
    %c0_i32_1 = arith.constant 0 : i32
    return %c0_i32, %c0_i32_0 : i32, i32
  }
  func.func @transform_15(%arg0: i32) -> (i32, i32) {
    %c0_i32 = arith.constant 0 : i32
    %c0_i32_0 = arith.constant 0 : i32
    %c0_i32_1 = arith.constant 0 : i32
    return %c0_i32, %c0_i32_0 : i32, i32
  }
  func.func @transform_16(%arg0: i32) -> (i32, i32) {
    %c0_i32 = arith.constant 0 : i32
    %c0_i32_0 = arith.constant 0 : i32
    %c0_i32_1 = arith.constant 0 : i32
    return %c0_i32, %c0_i32_0 : i32, i32
  }
  func.func @transform_17(%arg0: i32) -> (i32, i32) {
    %c0_i32 = arith.constant 0 : i32
    %c0_i32_0 = arith.constant 0 : i32
    %c0_i32_1 = arith.constant 0 : i32
    return %c0_i32, %c0_i32_0 : i32, i32
  }
  func.func @transform_18(%arg0: i32) -> (i32, i32, i32) {
    %c0_i32 = arith.constant 0 : i32
    %c0_i32_0 = arith.constant 0 : i32
    %c0_i32_1 = arith.constant 0 : i32
    return %arg0, %c0_i32, %c0_i32_0 : i32, i32, i32
  }
}

</mosaic_0001>

<bundles_post_ra>
// kernel: tpu_custom_call.1
= control target key start
LH: loop header
LB: loop body
LE: loop exit
PB: predicated region body
PF: predicated region fallthrough
CT: control target
= control target key end

     0   :  { %s5162_s0 = inlined_call_operand.vmem [shape: f32[2,24,6], index: 0, kind: input, shape index: {}]   ;;  %s5163_s1 = inlined_call_operand.hbm [shape: f32[2,24,24], index: 1, kind: input, shape index: {}]   ;;  %s5164_s2 = inlined_call_operand.vmem [shape: f32[2,24,1], index: 2, kind: input, shape index: {}]   ;;  %s5165_s3 = inlined_call_operand.vmem [shape: f32[2,24,1], index: 3, kind: input, shape index: {}]   ;;  %s5166_s4 = inlined_call_operand.hbm [shape: f32[4,24], index: 4, kind: input, shape index: {}]   ;;  %s5167_s5 = inlined_call_operand.hbm [shape: f32[6,32], index: 5, kind: input, shape index: {}]   ;;  %s5168_s6 = inlined_call_operand.vmem [shape: f32[1,32], index: 6, kind: input, shape index: {}]   ;;  %s5169_s7 = inlined_call_operand.vmem [shape: f32[64,64], index: 7, kind: input, shape index: {}]   ;;  %s5170_s8 = inlined_call_operand.hbm [shape: f32[1,64], index: 8, kind: input, shape index: {}]   ;;  %s5171_s9 = inlined_call_operand.vmem [shape: f32[3,64,96], index: 9, kind: input, shape index: {}]   ;;  %s5172_s10 = inlined_call_operand.hbm [shape: f32[3,32,96], index: 10, kind: input, shape index: {}]   ;;  %s5173_s11 = inlined_call_operand.hbm [shape: f32[3,1,96], index: 11, kind: input, shape index: {}]   ;;  %s5174_s12 = inlined_call_operand.hbm [shape: f32[3,1,96], index: 12, kind: input, shape index: {}]   ;;  %s5175_s13 = inlined_call_operand.vmem [shape: f32[32,64], index: 13, kind: input, shape index: {}]   ;;  %s5176_s14 = inlined_call_operand.vmem [shape: f32[1,64], index: 14, kind: input, shape index: {}]   ;;  %s5177_s15 = inlined_call_operand.hbm [shape: f32[32,64], index: 15, kind: input, shape index: {}]   ;;  %s5178_s16 = inlined_call_operand.vmem [shape: f32[64,16], index: 16, kind: input, shape index: {}]   ;;  %s5179_s17 = inlined_call_operand.vmem [shape: f32[1,16], index: 17, kind: input, shape index: {}]   ;;  %s5180_s18 = inlined_call_operand.hbm [shape: f32[2,4,16], index: 18, kind: output, shape index: {}]  }
   0x1   :  { %5193 = sst [smem:[#allocation23_spill]] %s5162_s0 }
   0x2   :  { %5194 = sst [smem:[#allocation24_spill]] %s5163_s1 }
   0x3   :  { %5195 = sst [smem:[#allocation25_spill]] %s5164_s2 }
   0x4   :  { %5196 = sst [smem:[#allocation26_spill]] %s5165_s3 }
   0x5   :  { %5197 = sst [smem:[#allocation27_spill]] %s5166_s4 }
   0x6   :  { %5198 = sst [smem:[#allocation28_spill]] %s5167_s5 }
   0x7   :  { %5199 = sst [smem:[#allocation29_spill]] %s5170_s8 }
   0x8   :  { %5200 = sst [smem:[#allocation30_spill]] %s5171_s9 }
   0x9   :  { %5201 = sst [smem:[#allocation31_spill]] %s5175_s13 }
   0xa   :  { %5202 = sst [smem:[#allocation32_spill]] %s5176_s14 }
   0xb   :  { %5203 = sst [smem:[#allocation33_spill]] %s5178_s16 }
   0xc   :  { %5204 = sst [smem:[#allocation34_spill]] %s5179_s17 }
   0xd   :  { %5205 = sst [smem:[#allocation35_spill]] %s5180_s18 }
   0xe   :  { %23 = vsyncpa [#allocation3], 0 }
   0xf   :  { %25 = vsyncpa [#allocation3 + $0x1], 0 }
  0x10   :  { %26 = vsyncpa [#allocation6], 0 }
  0x11   :  { %27 = vsyncpa [#allocation9], 0 }
  0x12   :  { %28 = vsyncpa [#allocation12], 0 }
  0x13   :  { %29 = vsyncpa [#allocation15], 0 }
  0x14   :  { %30 = vsyncpa [#allocation4], 0 }
  0x15   :  { %32 = vsyncpa [#allocation4 + $0x1], 0  ;;  %s4239_s27 = smov 0   ;;  %s4241_s28 = smov 0  }
  0x16   :  { %s4243_s29 = smov 0   ;;  %s4245_s30 = smov 0  }
  0x17 LB: > { %s4124_s0 = smov [#allocation5]   ;;  %s4260_s1 = sadd.s32 4294967295, %s4122_s30   ;;  %s4122_s30 = sphi %s4245_s30, %s5246_s30   ;;  %s4118_s29 = sphi %s4243_s29, %s5245_s29   ;;  %s4114_s28 = sphi %s4241_s28, %s5244_s28   ;;  %s4110_s27 = sphi %s4239_s27, %s5243_s27  }
  0x18   : > { %s480_s19 = sshll.u32 %s4124_s0, 4  ;;  %p2917_p0 = scmp.ge.s32.totalorder %s4122_s30, 1  ;;  %s481_s19 = int_to_ptr.vmem [resolvable:$true] %s480_s19 }
  0x19   : > { %p5184_p1 = scmp.eq.s32.totalorder %s4260_s1, 0  ;;  %p467_p2 = scmp.lt.s32.totalorder %s4122_s30, 3 }
  0x1a   : > { %s4125_s21 = smov [#allocation8]   ;;  %s4126_s2 = smov [#allocation11]  }
  0x1b   : > { %p4265_p3 = pnand %p2917_p0, %p467_p2  ;;  %s508_s22 = sshll.u32 %s4125_s21, 4  ;;  %s4272_s22 = int_to_ptr.vmem [resolvable:$true] %s508_s22 }
  0x1c   : > { %s534_s23 = sshll.u32 %s4126_s2, 4  ;;  %s5208_s4 = sld [smem:[#allocation27_spill]]  ;;  %s4280_s23 = int_to_ptr.vmem [resolvable:$true] %s534_s23 }
  0x1d   : > { %s5206_s20 = scalar_select %p4265_p3, 1, 0 }
  0x1e   : > { %p3650_p5 = pneg %p4265_p3 }
  0x20   : > { %p4276_p6 = pnand %p3650_p5, %p5184_p1 }
  0x22   : > { %s3814_s0 = scalar_lea.hbm %s5208_s4, 64  ;;  %p4290_p8 = pneg %p4276_p6 }
  0x23   : > { %p3815_p7 = scmp.ne.s32.totalorder %s5208_s4, %s3814_s0  ;;  %p3821_p11 = scmp.lt.u32.totalorder %s3814_s0, %s5208_s4 }
  0x25   : > { %p3817_p9 = pnand %p4290_p8, %p3815_p7 }
  0x27   : > { %p3818_p10 = pneg %p3817_p9 }
  0x29   : > { %p3823_p12 = pnand %p3821_p11, %p3818_p10 }
  0x2b   : > { %3826 = shalt.err (!%p3823_p12)
}
  0x2c   : > { %s3827_s25 = scalar_lea.vmem %s481_s19, 64  ;;  %p3835_p5 = scmp.lt.s32.totalorder %s481_s19, %s481_s19 }
  0x2d   : > { %p3828_p13 = scmp.ne.s32.totalorder %s481_s19, %s3827_s25  ;;  %p3836_p4 = scmp.lt.s32.totalorder %s3827_s25, %s3827_s25 }
  0x2f   : > { %p3830_p0 = pnand %p3828_p13, %p4290_p8  ;;  %p3837_p1 = por %p3836_p4, %p3835_p5 }
  0x31   : > { %p3831_p2 = pneg %p3830_p0 }
  0x33   : > { %p3838_p3 = pnand %p3837_p1, %p3831_p2 }
  0x35   : > { %3841 = shalt.err (!%p3838_p3)
}
  0x36   : > { %3653 = dma.hbm_to_vmem [thread:$0]  (!%p4276_p6), %s5208_s4, 64, %s481_s19, [#allocation6]  }
  0x37   : > { %s5210_s8 = sld [smem:[#allocation29_spill]] }
  0x3d   : > { %s3842_s0 = scalar_lea.hbm %s5210_s8, 16 }
  0x3e   : > { %p3843_p7 = scmp.ne.s32.totalorder %s5210_s8, %s3842_s0  ;;  %p3849_p1 = scmp.lt.u32.totalorder %s3842_s0, %s5210_s8 }
  0x40   : > { %p3845_p9 = pnand %p3843_p7, %p4290_p8 }
  0x42   : > { %p3846_p4 = pneg %p3845_p9 }
  0x44   : > { %p3851_p3 = pnand %p3849_p1, %p3846_p4 }
  0x46   : > { %3854 = shalt.err (!%p3851_p3)
}
  0x47   : > { %s3855_s19 = scalar_lea.vmem %s4272_s22, 16  ;;  %s3862_s14 = scalar_lea.vmem %s4272_s22, 32 }
  0x48   : > { %p3856_p10 = scmp.ne.s32.totalorder %s4272_s22, %s3855_s19  ;;  %p3863_p13 = scmp.lt.s32.totalorder %s4272_s22, %s4272_s22 }
  0x49   : > { %p3864_p0 = scmp.lt.s32.totalorder %s3862_s14, %s3855_s19 }
  0x4a   : > { %p3858_p11 = pnand %p3856_p10, %p4290_p8 }
  0x4b   : > { %p3865_p2 = por %p3864_p0, %p3863_p13 }
  0x4c   : > { %p3859_p12 = pneg %p3858_p11 }
  0x4e   : > { %p3866_p5 = pnand %p3865_p2, %p3859_p12 }
  0x50   : > { %3869 = shalt.err (!%p3866_p5)
}
  0x51   : > { %3659 = dma.hbm_to_vmem [thread:$0]  (!%p4276_p6), %s5210_s8, 16, %s4272_s22, [#allocation9]  }
  0x52   : > { %s3870_s26 = scalar_lea.hbm %s5173_s11, 48 }
  0x53   : > { %p3871_p7 = scmp.ne.s32.totalorder %s5173_s11, %s3870_s26  ;;  %p3877_p1 = scmp.lt.u32.totalorder %s3870_s26, %s5173_s11 }
  0x55   : > { %p3873_p9 = pnand %p3871_p7, %p4290_p8 }
  0x57   : > { %p3874_p4 = pneg %p3873_p9 }
  0x59   : > { %p3879_p3 = pnand %p3877_p1, %p3874_p4 }
  0x5b   : > { %3882 = shalt.err (!%p3879_p3)
}
  0x5c   : > { %s3883_s22 = scalar_lea.vmem %s4280_s23, 48  ;;  %s3890_s14 = scalar_lea.vmem %s4280_s23, 64 }
  0x5d   : > { %p3884_p10 = scmp.ne.s32.totalorder %s4280_s23, %s3883_s22  ;;  %p3891_p13 = scmp.lt.s32.totalorder %s4280_s23, %s4280_s23 }
  0x5e   : > { %p3892_p0 = scmp.lt.s32.totalorder %s3890_s14, %s3883_s22 }
  0x5f   : > { %p3886_p11 = pnand %p3884_p10, %p4290_p8 }
  0x60   : > { %p3893_p2 = por %p3892_p0, %p3891_p13 }
  0x61   : > { %p3887_p12 = pneg %p3886_p11 }
  0x63   : > { %p3894_p5 = pnand %p3893_p2, %p3887_p12 }
  0x65   : > { %3897 = shalt.err (!%p3894_p5)
}
  0x66   : > { %s5188_s13 = smov 16   ;;  %s5189_s17 = smov 1  }
  0x67   : > { %3665 = dma.hbm_to_vmem [thread:$0]  (!%p4276_p6), %s5173_s11, 48, %s4280_s23, [#allocation12], %s5188_s13, %s5188_s13, %s5189_s17  }
  0x68   : > { %s4129_s26 = smov [#allocation7]   ;;  %s4130_s2 = smov [#allocation10]  }
  0x69   : > { %s491_s0 = sshll.u32 %s4129_s26, 4  ;;  %s521_s25 = sshll.u32 %s4130_s2, 4  ;;  %s492_s0 = int_to_ptr.vmem [resolvable:$true] %s491_s0  ;;  %s522_s25 = int_to_ptr.vmem [resolvable:$true] %s521_s25 }
  0x6a   : > { %s5211_s5 = sld [smem:[#allocation28_spill]] }
  0x70   : > { %s3898_s14 = scalar_lea.hbm %s5211_s5, 128 }
  0x71   : > { %p3899_p7 = scmp.ne.s32.totalorder %s5211_s5, %s3898_s14  ;;  %p3905_p1 = scmp.lt.u32.totalorder %s3898_s14, %s5211_s5 }
  0x73   : > { %p3901_p9 = pnand %p3899_p7, %p4290_p8 }
  0x75   : > { %p3902_p4 = pneg %p3901_p9 }
  0x77   : > { %p3907_p3 = pnand %p3905_p1, %p3902_p4 }
  0x79   : > { %3910 = shalt.err (!%p3907_p3)
}
  0x7a   : > { %s3911_s23 = scalar_lea.vmem %s492_s0, 128  ;;  %p3919_p13 = scmp.lt.s32.totalorder %s492_s0, %s492_s0 }
  0x7b   : > { %p3912_p10 = scmp.ne.s32.totalorder %s492_s0, %s3911_s23  ;;  %p3920_p0 = scmp.lt.s32.totalorder %s3911_s23, %s3911_s23 }
  0x7d   : > { %p3914_p11 = pnand %p3912_p10, %p4290_p8  ;;  %p3921_p2 = por %p3920_p0, %p3919_p13 }
  0x7f   : > { %p3915_p12 = pneg %p3914_p11 }
  0x81   : > { %p3922_p5 = pnand %p3921_p2, %p3915_p12 }
  0x83   : > { %3925 = shalt.err (!%p3922_p5)
}
  0x84   : > { %3656 = dma.hbm_to_vmem [thread:$0]  (!%p4276_p6), %s5211_s5, 128, %s492_s0, [#allocation6]  }
  0x85   : > { %s3926_s18 = scalar_lea.hbm %s5172_s10, 1536 }
  0x86   : > { %p3927_p7 = scmp.ne.s32.totalorder %s5172_s10, %s3926_s18  ;;  %p3933_p1 = scmp.lt.u32.totalorder %s3926_s18, %s5172_s10 }
  0x88   : > { %p3929_p9 = pnand %p3927_p7, %p4290_p8 }
  0x8a   : > { %p3930_p4 = pneg %p3929_p9 }
  0x8c   : > { %p3935_p3 = pnand %p3933_p1, %p3930_p4 }
  0x8e   : > { %3938 = shalt.err (!%p3935_p3)
}
  0x8f   : > { %s3939_s22 = scalar_lea.vmem %s522_s25, 1536  ;;  %p3947_p13 = scmp.lt.s32.totalorder %s522_s25, %s522_s25 }
  0x90   : > { %p3940_p10 = scmp.ne.s32.totalorder %s522_s25, %s3939_s22  ;;  %p3948_p0 = scmp.lt.s32.totalorder %s3939_s22, %s3939_s22 }
  0x92   : > { %p3942_p11 = pnand %p3940_p10, %p4290_p8  ;;  %p3949_p2 = por %p3948_p0, %p3947_p13 }
  0x94   : > { %p3943_p12 = pneg %p3942_p11 }
  0x96   : > { %p3950_p5 = pnand %p3949_p2, %p3943_p12 }
  0x98   : > { %3953 = shalt.err (!%p3950_p5)
}
  0x99   : > { %s5190_s0 = smov 128   ;;  %s5191_s14 = smov 8  }
  0x9a   : > { %3662 = dma.hbm_to_vmem [thread:$0]  (!%p4276_p6), %s5172_s10, 1536, %s522_s25, [#allocation9], %s5190_s0, %s5190_s0, %s5191_s14  }
  0x9b   : > { %s4133_s8 = smov [#allocation13]   ;;  %s4134_s9 = smov [#allocation14]  }
  0x9c   : > { %s547_s3 = sshll.u32 %s4133_s8, 4  ;;  %s566_s18 = sshll.u32 %s4134_s9, 4  ;;  %s548_s3 = int_to_ptr.vmem [resolvable:$true] %s547_s3  ;;  %s567_s18 = int_to_ptr.vmem [resolvable:$true] %s566_s18 }
  0x9d   : > { %s3954_s2 = scalar_lea.hbm %s5174_s12, 48 }
  0x9e   : > { %p3955_p7 = scmp.ne.s32.totalorder %s5174_s12, %s3954_s2  ;;  %p3961_p1 = scmp.lt.u32.totalorder %s3954_s2, %s5174_s12 }
  0xa0   : > { %p3957_p9 = pnand %p3955_p7, %p4290_p8 }
  0xa2   : > { %p3958_p4 = pneg %p3957_p9 }
  0xa4   : > { %p3963_p3 = pnand %p3961_p1, %p3958_p4 }
  0xa6   : > { %3966 = shalt.err (!%p3963_p3)
}
  0xa7   : > { %s3967_s25 = scalar_lea.vmem %s548_s3, 48  ;;  %s3974_s23 = scalar_lea.vmem %s548_s3, 64 }
  0xa8   : > { %p3968_p10 = scmp.ne.s32.totalorder %s548_s3, %s3967_s25  ;;  %p3975_p13 = scmp.lt.s32.totalorder %s548_s3, %s548_s3 }
  0xa9   : > { %p3976_p0 = scmp.lt.s32.totalorder %s3974_s23, %s3967_s25 }
  0xaa   : > { %p3970_p11 = pnand %p3968_p10, %p4290_p8 }
  0xab   : > { %p3977_p2 = por %p3976_p0, %p3975_p13 }
  0xac   : > { %p3971_p12 = pneg %p3970_p11 }
  0xae   : > { %p3978_p5 = pnand %p3977_p2, %p3971_p12 }
  0xb0   : > { %3981 = shalt.err (!%p3978_p5)
}
  0xb1   : > { %s5212_s4 = smov 1   ;;  %s5213_s8 = smov 16  }
  0xb2   : > { %3668 = dma.hbm_to_vmem [thread:$0]  (!%p4276_p6), %s5174_s12, 48, %s548_s3, [#allocation12], %s5213_s8, %s5213_s8, %s5212_s4  }
  0xb3   : > { %s3982_s26 = scalar_lea.hbm %s5177_s15, 512 }
  0xb4   : > { %p3983_p7 = scmp.ne.s32.totalorder %s5177_s15, %s3982_s26  ;;  %p3989_p1 = scmp.lt.u32.totalorder %s3982_s26, %s5177_s15 }
  0xb6   : > { %p3985_p9 = pnand %p3983_p7, %p4290_p8 }
  0xb8   : > { %p3986_p4 = pneg %p3985_p9 }
  0xba   : > { %p3991_p3 = pnand %p3989_p1, %p3986_p4 }
  0xbc   : > { %3994 = shalt.err (!%p3991_p3)
}
  0xbd   : > { %s3995_s23 = scalar_lea.vmem %s567_s18, 512  ;;  %p4003_p13 = scmp.lt.s32.totalorder %s567_s18, %s567_s18 }
  0xbe   : > { %p3996_p10 = scmp.ne.s32.totalorder %s567_s18, %s3995_s23  ;;  %p4004_p0 = scmp.lt.s32.totalorder %s3995_s23, %s3995_s23 }
  0xc0   : > { %p3998_p11 = pnand %p3996_p10, %p4290_p8  ;;  %p4005_p2 = por %p4004_p0, %p4003_p13 }
  0xc2   : > { %p3999_p12 = pneg %p3998_p11 }
  0xc4   : > { %p4006_p5 = pnand %p4005_p2, %p3999_p12 }
  0xc6   : > { %4009 = shalt.err (!%p4006_p5)
}
  0xc7   : > { %3671 = dma.hbm_to_vmem [thread:$0]  (!%p4276_p6), %s5177_s15, 512, %s567_s18, [#allocation15], %s5190_s0, %s5190_s0, %s5191_s14  }
  0xc8   : > { %s2916_s24 = sadd.s32 4294967294, %s4122_s30   ;;  %s4440_s21 = sadd.s32 1, %s4122_s30  }
  0xc9   : > { %s71_s8 = sadd.s32 1, %s4118_s29  ;;  %s68_s13 = ssub.s32 %s4122_s30, %s4440_s21 }
  0xca   : > { %p78_p8 = scmp.ne.s32.totalorder %s4118_s29, %s4114_s28  ;;  %p69_p7 = scmp.eq.s32.totalorder %s68_s13, 0 }
  0xcb   : > { %p79_p9 = scmp.eq.s32.totalorder %s4122_s30, 0  ;;  %p84_p4 = scmp.ne.s32.totalorder %s4114_s28, %s4110_s27 }
  0xcc   : > { %p454_p1 = scmp.eq.s32.totalorder %s4260_s1, 1  ;;  %p5214_p10 = scmp.eq.s32.totalorder %s4260_s1, 0 }
  0xcd   : > { %s4452_s17 = scalar_select %p69_p7, %s4118_s29, %s71_s8  }
  0xce   : > { %p80_p3 = por %p79_p9, %p78_p8  ;;  %p4456_p11 = por %p5214_p10, %p84_p4 }
  0xcf   : > { %p4460_p6 = por %p454_p1, %p78_p8  ;;  %p460_p12 = scmp.eq.s32.totalorder %s2916_s24, 1 }
  0xd0   : > { %p3687_p13 = scmp.lt.s32.totalorder %s4122_s30, 2  ;;  %s594_s16 = sand.u32 1, %s4118_s29  }
  0xd1   : > { %s5216_s18 = scalar_select %p4460_p6, 1, 0 }
  0xd2   : > { %p4466_p0 = por %p460_p12, %p84_p4  ;;  %s3614_s2 = smul.u32 24, %s594_s16 }
  0xd3   : > { %p4470_p2 = pnand %p3687_p13, %p80_p3  ;;  %s3615_s22 = smul.u32 384, %s4122_s30 }
  0xd4   : > { %s5217_s26 = scalar_select %p4466_p0, 1, 0 }
  0xd5   : > { %s5219_s3 = sld [smem:[#allocation24_spill]]  ;;  %s598_s24 = scalar_lea.vmem [#allocation2], %s3614_s2 }
  0xd6   : > { %s605_s8 = sshll.u32 %s598_s24, 4  ;;  %s4482_s13 = scalar_lea.sflag [#allocation3], %s594_s16  ;;  %s4480_s8 = int_to_ptr.vmem [resolvable:$true] %s605_s8 }
  0xd7   : > { %p4012_p8 = pneg %p4470_p2 }
  0xdb   : > { %s4478_s4 = scalar_lea.hbm %s5219_s3, %s3615_s22  ;;  %s4015_s23 = scalar_lea.hbm %s5219_s3, 768 }
  0xdc   : > { %s4010_s0 = scalar_lea.hbm %s4478_s4, 384  ;;  %p4016_p4 = scmp.lt.u32.totalorder %s4478_s4, %s5219_s3 }
  0xdd   : > { %p4011_p5 = scmp.ne.s32.totalorder %s4478_s4, %s4010_s0  ;;  %p4017_p1 = scmp.lt.u32.totalorder %s4015_s23, %s4010_s0 }
  0xde   : > { %p4019_p10 = scmp.lt.u32.totalorder %s4010_s0, %s4478_s4 }
  0xdf   : > { %p4013_p7 = pnand %p4012_p8, %p4011_p5  ;;  %p4018_p3 = por %p4017_p1, %p4016_p4 }
  0xe1   : > { %p4014_p9 = pneg %p4013_p7  ;;  %p4020_p12 = por %p4019_p10, %p4018_p3 }
  0xe3   : > { %p4021_p13 = pnand %p4020_p12, %p4014_p9 }
  0xe5   : > { %4024 = shalt.err (!%p4021_p13)
}
  0xe6   : > { %s4025_s16 = scalar_lea.vmem %s4480_s8, 384  ;;  %s4135_s2 = smov [#allocation2]  }
  0xe7   : > { %p4026_p5 = scmp.ne.s32.totalorder %s4480_s8, %s4025_s16  ;;  %s4030_s24 = sshll.u32 %s4135_s2, 4  ;;  %s4031_s24 = int_to_ptr.vmem [resolvable:$false] %s4030_s24 }
  0xe8   : > { %s4032_s5 = scalar_lea.vmem %s4031_s24, 768  ;;  %p4033_p6 = scmp.lt.s32.totalorder %s4480_s8, %s4031_s24 }
  0xe9   : > { %p4028_p7 = pnand %p4026_p5, %p4012_p8  ;;  %p4034_p4 = scmp.lt.s32.totalorder %s4032_s5, %s4025_s16 }
  0xeb   : > { %p4029_p0 = pneg %p4028_p7  ;;  %p4035_p1 = por %p4034_p4, %p4033_p6 }
  0xed   : > { %p4036_p3 = pnand %p4035_p1, %p4029_p0 }
  0xef   : > { %4039 = shalt.err (!%p4036_p3)
}
  0xf0   : > { %s5220_s0 = smov 8   ;;  %s5221_s14 = smov 128  }
  0xf1   : > { %3675 = dma.hbm_to_vmem [thread:$0]  (!%p4470_p2), %s4478_s4, 384, %s4480_s8, %s4482_s13, %s5221_s14, %s5221_s14, %s5220_s0  }
  0xf2   : > { %p5222_p8 = scmp.ne.s32.totalorder %s5206_s20, 0 }
  0xf3   : > { %s4516_s22 = sand.u32 (!%p5222_p8), 1, %s4114_s28  }
  0xf4   : > { %633 = sbr.rel (%p5222_p8) target bundleno = 4416 (0x1140), region = 92  ;;  %s636_s23 = scalar_lea.sflag (!%p5222_p8), [#allocation3], %s4516_s22 }
  0xf5   : > { %s3616_s25 = smul.u32 (!%p5222_p8), 24, %s4516_s22 }
  0xf7   : > { %s4520_s16 = scalar_lea.vmem (!%p5222_p8), [#allocation2], %s3616_s25 }
  0xfb   : > { %4085 = dma.done.wait (%p4456_p11), %s636_s23, 384  }
  0xfc   : > { %4087 = vsyncadd (%p4456_p11), %s636_s23, 4294966912  ;;  %p5223_p6 = scmp.eq.s32.totalorder %s4260_s1, 0 }
  0xfe   : > { %4089 = dma.done.wait (%p5223_p6), [#allocation6], 192   ;;  %p5224_p0 = pmov %p5223_p6 }
 0x100   : > { %4091 = vsyncadd (%p5224_p0), [#allocation6], 4294967104  ;;  %p5225_p2 = pmov %p5224_p0 }
 0x101   : > { %p5226_p9 = pmov %p5224_p0 }
 0x102   : > { %4093 = dma.done.wait (%p5225_p2), [#allocation9], 1552  }
 0x103   : > { %4095 = vsyncadd (%p5226_p9), [#allocation9], 4294965744  ;;  %p5227_p10 = pmov %p5224_p0 }
 0x104   : > { %p5228_p12 = pmov %p5224_p0 }
 0x105   : > { %4097 = dma.done.wait (%p5227_p10), [#allocation12], 96  }
 0x106   : > { %4099 = vsyncadd (%p5228_p12), [#allocation12], 4294967200  ;;  %p5229_p11 = pmov %p5224_p0 }
 0x107   : > { %p5230_p13 = pmov %p5224_p0 }
 0x108   : > { %4101 = dma.done.wait (%p5229_p11), [#allocation15], 512  }
 0x109   : > { %4103 = vsyncadd (%p5230_p13), [#allocation15], 4294966784  ;;  %p735_p5 = scmp.lt.s32.totalorder %s4260_s1, 1  ;;  %v4136_v0 = vmov 0.0   ;;  %vm4137_vm0 = vmmov 0   ;;  %v4138_v1 = vmov 0  }
 0x10a   : > { %3165 = vmatprep.subr.mxu0 %v4136_v0  ;;  %3167 = vmatprep.mubr.msk.f32.mxu0 %vm4137_vm0, %v4136_v0  ;;  %vm783_vm1 = vcmask 1045504   ;;  %s5231_s8 = sld [smem:[#allocation23_spill]]  ;;  %vm773_vm2 = vcmask 48128   ;;  %s5232_s5 = sld [smem:[#allocation25_spill]]  ;;  %v765_v2 = vld [vmem:[#allocation7] sm:$0x3f] }
 0x10b   : > { %s736_s20 = scalar_select %p735_p5, %s4260_s1, 1  ;;  %3746 = vset.pattern.permute.xlu0 %v4138_v1  ;;  %3747 = vset.pattern.permute.xlu1 %v4138_v1  ;;  %v4139_v9 = vmov 0.0|0.0   ;;  %v2939_v10 = vld [vmem:[%s5168_s6] ss:$0 sm:$0xff]  ;;  %v868_v13 = vld [vmem:[%s5169_s7 + $0x8] sm:$0xff]  ;;  %v869_v14 = vld [vmem:[%s5169_s7 + $0x10] sm:$0xff] }
 0x10c   : > { %3182 = vmatprep.mubr.msk.f32.mxu1 %vm4137_vm0, %v4136_v0  ;;  %3166 = vmatpush3.msk.msra.mxu0 %vm783_vm1, %v765_v2  ;;  %v867_v12 = vld [vmem:[%s5169_s7] sm:$0xff]  ;;  %v870_v17 = vld [vmem:[%s5169_s7 + $0x18] sm:$0xff]  ;;  %v872_v23 = vld [vmem:[%s5169_s7 + $0x28] sm:$0xff]  ;;  %s4140_s23 = smov 32   ;;  %vm900_vm3 = vcmask 195584   ;;  %s5233_s24 = sld [smem:[#allocation30_spill]] }
 0x10d   : > { %s4551_s9 = smul.u32 24, %s736_s20  ;;  %3484 = vmatprep.subr.bf16.mxu1 %v4139_v9  ;;  %3487 = vmatprep.subr.bf16.mxu0 %v4139_v9  ;;  %v4586_v16 = vpack.c.bf16 %v868_v13, %v867_v12  ;;  %v4594_v20 = vpack.c.bf16 %v870_v17, %v869_v14  ;;  %v871_v22 = vld [vmem:[%s5169_s7 + $0x20] sm:$0xff]  ;;  %v873_v31 = vld [vmem:[%s5169_s7 + $0x30] sm:$0xff]  ;;  %v874_v32 = vld [vmem:[%s5169_s7 + $0x38] sm:$0xff]  ;;  %vm1005_vm4 = vcmask 261120   ;;  %vm1009_vm5 = vcmask 523264  }
 0x10e   : > { %v4611_v28 = vpack.c.bf16 %v872_v23, %v871_v22  ;;  %v4631_v37 = vpack.c.bf16 %v874_v32, %v873_v31  ;;  %v4634_v38 = vld [vmem:[%s4520_s16] sm:$0xff]  ;;  %v4647_v40 = vld [vmem:[%s4520_s16 + $0x8] sm:$0xff]  ;;  %v4656_v41 = vld [vmem:[%s4520_s16 + $0x10] sm:$0xff]  ;;  %s4141_s25 = smov 64   ;;  %s5234_s19 = sld [smem:[#allocation26_spill]]  ;;  %vm2727_vm12 = vcmask 125952  }
 0x10f   : > { %v1203_v51 = vld [vmem:[#allocation10] sm:$0xff]  ;;  %v1204_v52 = vld [vmem:[#allocation10 + $0x8] sm:$0xff]  ;;  %v1205_v56 = vld [vmem:[#allocation10 + $0x10] sm:$0xff]  ;;  %s5236_s20 = sld [smem:[#allocation32_spill]]  ;;  %s3026_s16 = sshll.u32 %s4260_s1, 6 }
 0x110   : > { %s739_s13 = scalar_lea.vmem %s5231_s8, %s4551_s9  ;;  %s744_s0 = scalar_lea.vmem %s5232_s5, %s4551_s9  ;;  %v3512_v53 = vpack.c.bf16 %v1204_v52, %v1203_v51  ;;  %v1206_v57 = vld [vmem:[#allocation10 + $0x18] sm:$0xff]  ;;  %v2955_v31 = vld [vmem:[#allocation13] ss:$0 sm:$0xff] }
 0x111   : > { %v750_v3 = vld [vmem:[%s739_s13] sm:$0xff]  ;;  %v758_v5 = vld [vmem:[%s744_s0 + $0x10] sm:$0xff]  ;;  %v751_v6 = vld [vmem:[%s739_s13 + $0x8] sm:$0xff]  ;;  %v3515_v60 = vpack.c.bf16 %v1206_v57, %v1205_v56  ;;  %s5235_s8 = sld [smem:[#allocation31_spill]]  ;;  %s2935_s5 = sshll.u32 %s4516_s22, 2 }
 0x112   : > { %v756_v4 = vld [vmem:[%s744_s0] sm:$0xff]  ;;  %3168 = vmatmul.mubr.msk.f32.vlgmr.msra.gmra.mrb[0].mxu0 %vm773_vm2, %v750_v3  ;;  %v757_v7 = vld [vmem:[%s744_s0 + $0x8] sm:$0xff]  ;;  %888 = vperm.xlu1 %3747, %v758_v5   ;;  %v752_v8 = vld [vmem:[%s739_s13 + $0x10] sm:$0xff]  ;;  %s5239_s13 = sld [smem:[#allocation35_spill]]  ;;  %s2730_s0 = scalar_lea.sflag [#allocation4], %s4516_s22 }
 0x113   : > { %878 = vperm.xlu0 %3746, %v756_v4   ;;  %3170 = vmatprep.mubr.msk.f32.mxu0 %vm4137_vm0, %v4136_v0  ;;  %v1099_v42 = vld [vmem:[%s5233_s24] sm:$0xff]  ;;  %v1100_v43 = vld [vmem:[%s5233_s24 + $0x8] sm:$0xff]  ;;  %v1101_v44 = vld [vmem:[%s5233_s24 + $0x10] sm:$0xff]  ;;  %p5240_p4 = scmp.ne.s32.totalorder %s5216_s18, 0  ;;  %s4143_s1 = smov [#allocation16]  }
 0x114   : > { %3489 = vmatpush3.bf16.msra.mxu0 %v4586_v16  ;;  %v3500_v45 = vpack.c.bf16 %v1100_v43, %v1099_v42  ;;  %v1102_v46 = vld [vmem:[%s5233_s24 + $0x18] sm:$0xff]  ;;  %v1103_v48 = vld [vmem:[%s5233_s24 + $0x20] sm:$0xff]  ;;  %v1104_v49 = vld [vmem:[%s5233_s24 + $0x28] sm:$0xff]  ;;  %s749_s4 = scalar_lea.vmem %s5234_s19, %s4551_s9  ;;  %s4142_s9 = smov 96  }
 0x115   : > { %3490 = vmatprep.subr.bf16.mxu0 %v4139_v9  ;;  %v3503_v47 = vpack.c.bf16 %v1102_v46, %v1101_v44  ;;  %v3506_v50 = vpack.c.bf16 %v1104_v49, %v1103_v48  ;;  %v2944_v12 = vld [vmem:[#allocation8] ss:$0 sm:$0xff] }
 0x116   : > { %3171 = vmatmul.mubr.msk.f32.gmra.mrb[2].mxu0 %vm773_vm2, %v751_v6 }
 0x117   : > { %883 = vperm.xlu0 %3746, %v757_v7   ;;  %3173 = vmatprep.mubr.msk.f32.mxu0 %vm4137_vm0, %v4136_v0  ;;  %v1105_v7 = vld [vmem:[%s5233_s24 + $0x30] sm:$0xff] }
 0x118   : > { %3492 = vmatpush3.bf16.msra.mxu0 %v4594_v20  ;;  %s5118_s2 = scalar_lea.hbm %s5239_s13, %s3026_s16 }
 0x119   : > { %3493 = vmatprep.subr.bf16.mxu0 %v4139_v9 }
 0x11a   : > { %3174 = vmatmul.mubr.msk.f32.gmra.mrb[4].mxu0 %vm773_vm2, %v752_v8  ;;  %v1106_v8 = vld [vmem:[%s5233_s24 + $0x38] sm:$0xff] }
 0x11b   : > { %3207 = vmatprep.mubr.msk.f32.mxu0 %vm4137_vm0, %v4136_v0 }
 0x11c   : > { %3495 = vmatpush3.bf16.msra.mxu0 %v4611_v28 }
 0x11d   : > { %3496 = vmatprep.subr.bf16.mxu0 %v4139_v9 }
 0x120   : > { %3498 = vmatpush3.bf16.msra.mxu0 %v4631_v37 }
 0x121   : > { %3511 = vmatprep.subr.bf16.mxu0 %v4139_v9 }
 0x191   : > { %v4624_v34 = vpop.permute.xlu1 %888 }
 0x192   : > { %v4575_v11 = vpop.permute.xlu0 %878 }
 0x193   : > { %v4725_v13 = vmul.f32 %v2944_v12, %v4575_v11 }
 0x196   : > { %v4605_v25 = vpop.permute.xlu0 %883 }
 0x1e5   : > { %v853_v15 = vpop.f32.mrb[0].mxu0 }
 0x1e6   : > { %v4591_v18 = vadd.f32 %v2939_v10, %v853_v15  ;;  %v3169_v19 = vpop.f32.mrb[1].mxu0 }
 0x1e7   : > { %v4730_v19 = vmul.f32 %v2944_v12, %v4605_v25 }
 0x1e8   : > { %v990_v21 = vmul.f32 %v4575_v11, %v4591_v18 }
 0x1e9   : > { %v858_v24 = vpop.f32.mrb[2].mxu0 }
 0x1ea   : > { %v4607_v26 = vadd.f32 %v2939_v10, %v858_v24  ;;  %996 = vrot.lane.b32.xlu1 %v990_v21, %s4140_s23  ;;  %v3172_v27 = vpop.f32.mrb[3].mxu0  ;;  %v4737_v24 = vmul.f32 %v2944_v12, %v4624_v34  ;;  %v759_v12 = vld [vmem:[%s749_s4] sm:$0xff] }
 0x1eb   : > { %vm762_vm6 = vcmp.gt.f32.partialorder %v759_v12, 0.0  ;;  %v2968_v12 = vld [vmem:[%s5233_s24 + $0x40] sm:$0xff] }
 0x1ec   : > { %v991_v29 = vmul.f32 %v4605_v25, %v4607_v26  ;;  %v3485_v30 = vpack.c.bf16 %v4607_v26, %v4591_v18 }
 0x1ed   : > { %v863_v33 = vpop.f32.mrb[4].mxu0 }
 0x1ee   : > { %998 = vrot.lane.b32.xlu0 %v991_v29, %s4140_s23  ;;  %v4627_v35 = vadd.f32 %v2939_v10, %v863_v33  ;;  %3486 = vmatpush3.bf16.msra.mxu1 %v3485_v30  ;;  %v3175_v36 = vpop.f32.mrb[5].mxu0  ;;  %v3509_v10 = vpack.c.bf16 %v1106_v8, %v1105_v7 }
 0x1ef   : > { %3180 = vmatprep.subr.mxu1 %v4136_v0 }
 0x1f0   : > { %v992_v39 = vmul.f32 %v4624_v34, %v4627_v35 }
 0x1f2   : > { %3181 = vmatpush3.msra.mxu1 %v4627_v35  ;;  %1000 = vrot.lane.b32.xlu1 %v992_v39, %s4140_s23 }
 0x1f3   : > { %3183 = vmatmul.mubr.msk.f32.vlgmr.msra.gmra.mrb[0].mxu1 %vm900_vm3, %v4634_v38  ;;  %3499 = vmatprep.subr.bf16.mxu1 %v4139_v9 }
 0x1f4   : > { %3185 = vmatprep.mubr.msk.f32.mxu1 %vm4137_vm0, %v4136_v0  ;;  %3501 = vmatpush3.bf16.msra.mxu1 %v3500_v45 }
 0x1f5   : > { %3502 = vmatprep.subr.bf16.mxu1 %v4139_v9 }
 0x1f7   : > { %3186 = vmatmul.mubr.msk.f32.gmra.mrb[2].mxu1 %vm900_vm3, %v4647_v40 }
 0x1f8   : > { %3188 = vmatprep.mubr.msk.f32.mxu1 %vm4137_vm0, %v4136_v0  ;;  %3504 = vmatpush3.bf16.msra.mxu1 %v3503_v47  ;;  %v2951_v47 = vld [vmem:[#allocation11] ss:$0 sm:$0xff] }
 0x1f9   : > { %3505 = vmatprep.subr.bf16.mxu1 %v4139_v9 }
 0x1fb   : > { %3189 = vmatmul.mubr.msk.f32.gmra.mrb[4].mxu1 %vm900_vm3, %v4656_v41 }
 0x1fc   : > { %3232 = vmatprep.mubr.msk.f32.mxu1 %vm4137_vm0, %v4136_v0  ;;  %3507 = vmatpush3.bf16.msra.mxu1 %v3506_v50 }
 0x1fd   : > { %3508 = vmatprep.subr.bf16.mxu1 %v4139_v9 }
 0x200   : > { %3510 = vmatpush3.bf16.msra.mxu1 %v3509_v10 }
 0x201   : > { %3517 = vmatprep.subr.bf16.mxu1 %v4139_v9 }
 0x25c   : > { %v997_v54 = vpop.permute.xlu1 %996 }
 0x260   : > { %v999_v61 = vpop.permute.xlu0 %998 }
 0x264   : > { %v1001_v3 = vpop.permute.xlu1 %1000 }
 0x2c6   : > { %v976_v55 = vpop.f32.mrb[0].mxu1 }
 0x2c7   : > { %v1006_v58 = vsel %vm1005_vm4, %v976_v55, %v997_v54  ;;  %v3184_v59 = vpop.f32.mrb[1].mxu1 }
 0x2c8   : > { %3208 = vmatmul.mubr.msk.f32.vlgmr.msra.gmra.mrb[6].mxu0 %vm1009_vm5, %v1006_v58 }
 0x2c9   : > { %3210 = vmatprep.mubr.msk.f32.mxu0 %vm4137_vm0, %v4136_v0  ;;  %3513 = vmatpush3.bf16.msra.mxu0 %v3512_v53 }
 0x2ca   : > { %v981_v62 = vpop.f32.mrb[2].mxu1  ;;  %3514 = vmatprep.subr.bf16.mxu0 %v4139_v9 }
 0x2cb   : > { %v1007_v63 = vsel %vm1005_vm4, %v981_v62, %v999_v61  ;;  %v3187_v2 = vpop.f32.mrb[3].mxu1 }
 0x2cc   : > { %3211 = vmatmul.mubr.msk.f32.gmra.mrb[8].mxu0 %vm1009_vm5, %v1007_v63 }
 0x2cd   : > { %3213 = vmatprep.mubr.msk.f32.mxu0 %vm4137_vm0, %v4136_v0  ;;  %3516 = vmatpush3.bf16.msra.mxu0 %v3515_v60 }
 0x2ce   : > { %v986_v4 = vpop.f32.mrb[4].mxu1  ;;  %3520 = vmatprep.subr.bf16.mxu0 %v4139_v9 }
 0x2cf   : > { %v1008_v5 = vsel %vm1005_vm4, %v986_v4, %v1001_v3  ;;  %v3190_v6 = vpop.f32.mrb[5].mxu1 }
 0x2d0   : > { %3214 = vmatmul.mubr.msk.f32.gmra.mrb[10].mxu0 %vm1009_vm5, %v1008_v5 }
 0x2d1   : > { %3249 = vmatprep.mubr.msk.f32.mxu0 %vm4137_vm0, %v4136_v0 }
 0x2d4   : > { %3250 = vmatmul.mubr.msk.f32.vlgmr.msra.gmra.mrb[12].mxu0 %vm1005_vm4, %v4591_v18 }
 0x2d5   : > { %3252 = vmatprep.mubr.msk.f32.mxu0 %vm4137_vm0, %v4136_v0  ;;  %3522 = vmatpush3.bf16.msra.mxu0 %v4586_v16 }
 0x2d6   : > { %3523 = vmatprep.subr.bf16.mxu0 %v4139_v9 }
 0x2d8   : > { %3253 = vmatmul.mubr.msk.f32.gmra.mrb[14].mxu0 %vm1005_vm4, %v4607_v26 }
 0x2d9   : > { %3255 = vmatprep.mubr.msk.f32.mxu0 %vm4137_vm0, %v4136_v0  ;;  %3525 = vmatpush3.bf16.msra.mxu0 %v4594_v20 }
 0x2da   : > { %3526 = vmatprep.subr.bf16.mxu0 %v4139_v9 }
 0x2dc   : > { %3256 = vmatmul.mubr.msk.f32.gmra.mrb[16].mxu0 %vm1005_vm4, %v4627_v35 }
 0x2dd   : > { %3528 = vmatpush3.bf16.msra.mxu0 %v4611_v28  ;;  %3289 = vmatprep.mubr.msk.f32.mxu0 %vm4137_vm0, %v4136_v0 }
 0x2de   : > { %3529 = vmatprep.subr.bf16.mxu0 %v4139_v9 }
 0x2e1   : > { %3531 = vmatpush3.bf16.msra.mxu0 %v4631_v37 }
 0x2e2   : > { %3544 = vmatprep.subr.bf16.mxu0 %v4139_v9 }
 0x39b   : > { %v1085_v14 = vpop.f32.mrb[6].mxu0 }
 0x39c   : > { %v1086_v15 = vadd.f32 %v1085_v14, %v4725_v13  ;;  %v3209_v17 = vpop.f32.mrb[7].mxu0 }
 0x39e   : > { %3233 = vmatmul.mubr.msk.f32.vlgmr.msra.gmra.mrb[6].mxu1 %vm1009_vm5, %v1086_v15 }
 0x39f   : > { %v1090_v21 = vpop.f32.mrb[8].mxu0  ;;  %3235 = vmatprep.mubr.msk.f32.mxu1 %vm4137_vm0, %v4136_v0 }
 0x3a0   : > { %v1091_v22 = vadd.f32 %v1090_v21, %v4730_v19  ;;  %v3212_v23 = vpop.f32.mrb[9].mxu0  ;;  %v760_v21 = vld [vmem:[%s749_s4 + $0x8] sm:$0xff] }
 0x3a1   : > { %vm763_vm7 = vcmp.gt.f32.partialorder %v760_v21, 0.0  ;;  %v2971_v21 = vld [vmem:[%s5233_s24 + $0x58] sm:$0xff] }
 0x3a2   : > { %3236 = vmatmul.mubr.msk.f32.gmra.mrb[8].mxu1 %vm1009_vm5, %v1091_v22 }
 0x3a3   : > { %v1095_v27 = vpop.f32.mrb[10].mxu0  ;;  %3238 = vmatprep.mubr.msk.f32.mxu1 %vm4137_vm0, %v4136_v0 }
 0x3a4   : > { %v1096_v29 = vadd.f32 %v1095_v27, %v4737_v24  ;;  %v3215_v30 = vpop.f32.mrb[11].mxu0  ;;  %v1390_v27 = vsel %vm762_vm6, 1, %v4138_v1 }
 0x3a5   : > { %v1391_v30 = vsel %vm763_vm7, 1, %v4138_v1 }
 0x3a6   : > { %3239 = vmatmul.mubr.msk.f32.gmra.mrb[10].mxu1 %vm1009_vm5, %v1096_v29 }
 0x3a7   : > { %v1289_v32 = vpop.f32.mrb[12].mxu0  ;;  %3264 = vmatprep.mubr.msk.f32.mxu1 %vm4137_vm0, %v4136_v0 }
 0x3a8   : > { %v1290_v33 = vadd.f32 %v2955_v31, %v1289_v32  ;;  %v3251_v36 = vpop.f32.mrb[13].mxu0 }
 0x3aa   : > { %1327 = vrot.lane.b32.xlu0 %v1290_v33, %s4141_s25 }
 0x3ab   : > { %v1294_v39 = vpop.f32.mrb[14].mxu0 }
 0x3ac   : > { %v1295_v42 = vadd.f32 %v2955_v31, %v1294_v39  ;;  %v3254_v43 = vpop.f32.mrb[15].mxu0 }
 0x3ae   : > { %1329 = vrot.lane.b32.xlu1 %v1295_v42, %s4141_s25 }
 0x3af   : > { %v1299_v44 = vpop.f32.mrb[16].mxu0 }
 0x3b0   : > { %v1300_v45 = vadd.f32 %v2955_v31, %v1299_v44  ;;  %v3257_v46 = vpop.f32.mrb[17].mxu0 }
 0x3b2   : > { %1331 = vrot.lane.b32.xlu0 %v1300_v45, %s4141_s25 }
 0x41c   : > { %v1328_v8 = vpop.permute.xlu0 %1327 }
 0x420   : > { %v1330_v15 = vpop.permute.xlu1 %1329 }
 0x424   : > { %v1332_v23 = vpop.permute.xlu0 %1331 }
 0x471   : > { %v1189_v48 = vpop.f32.mrb[6].mxu1 }
 0x472   : > { %v1190_v49 = vadd.f32 %v2951_v47, %v1189_v48  ;;  %v3234_v50 = vpop.f32.mrb[7].mxu1 }
 0x474   : > { %v1303_v51 = vadd.f32 %v1290_v33, %v1190_v49 }
 0x475   : > { %v1194_v52 = vpop.f32.mrb[8].mxu1 }
 0x476   : > { %v2959_v53 = vmul.f32 -1.442695, %v1303_v51  ;;  %v1195_v54 = vadd.f32 %v2951_v47, %v1194_v52  ;;  %v3237_v55 = vpop.f32.mrb[9].mxu1 }
 0x478   : > { %3748 = vpow2.f32 %v2959_v53  ;;  %v1304_v56 = vadd.f32 %v1295_v42, %v1195_v54  ;;  %v761_v42 = vld [vmem:[%s749_s4 + $0x10] sm:$0xff] }
 0x479   : > { %v1199_v57 = vpop.f32.mrb[10].mxu1  ;;  %vm764_vm8 = vcmp.gt.f32.partialorder %v761_v42, 0.0  ;;  %v1705_v42 = vld [vmem:[#allocation10 + $0x38] sm:$0xff] }
 0x47a   : > { %v2960_v58 = vmul.f32 -1.442695, %v1304_v56  ;;  %v1200_v59 = vadd.f32 %v2951_v47, %v1199_v57  ;;  %v3240_v60 = vpop.f32.mrb[11].mxu1 }
 0x47c   : > { %3750 = vpow2.f32 %v2960_v58  ;;  %v1305_v61 = vadd.f32 %v1300_v45, %v1200_v59  ;;  %v1392_v45 = vsel %vm764_vm8, 1, %v4138_v1 }
 0x47e   : > { %v2961_v62 = vmul.f32 -1.442695, %v1305_v61 }
 0x480   : > { %3752 = vpow2.f32 %v2961_v62 }
 0x482   : > { %v3749_v63 = vpop.eup %3748 }
 0x483   : > { %v1315_v2 = vadd.f32 1.0, %v3749_v63 }
 0x485   : > { %3754 = vrcp.f32 %v1315_v2 }
 0x486   : > { %v3751_v3 = vpop.eup %3750 }
 0x487   : > { %v1316_v4 = vadd.f32 1.0, %v3751_v3 }
 0x489   : > { %3756 = vrcp.f32 %v1316_v4 }
 0x48a   : > { %v3753_v5 = vpop.eup %3752 }
 0x48b   : > { %v1317_v6 = vadd.f32 1.0, %v3753_v5 }
 0x48d   : > { %3758 = vrcp.f32 %v1317_v6 }
 0x48f   : > { %v3755_v7 = vpop.eup %3754 }
 0x490   : > { %v1336_v10 = vmul.f32 %v3755_v7, %v1328_v8 }
 0x492   : > { %1342 = vrot.lane.b32.xlu1 %v1336_v10, %s4141_s25 }
 0x493   : > { %v3757_v14 = vpop.eup %3756 }
 0x494   : > { %v1337_v17 = vmul.f32 %v3757_v14, %v1330_v15  ;;  %v2970_v15 = vld [vmem:[%s5233_s24 + $0x50] sm:$0xff] }
 0x496   : > { %1344 = vrot.lane.b32.xlu0 %v1337_v17, %s4141_s25 }
 0x497   : > { %v3759_v22 = vpop.eup %3758 }
 0x498   : > { %v1338_v29 = vmul.f32 %v3759_v22, %v1332_v23  ;;  %v1359_v62 = vsub.f32 1.0, %v3759_v22  ;;  %v2972_v23 = vld [vmem:[%s5233_s24 + $0x60] sm:$0xff] }
 0x49a   : > { %1394 = vperm.xlu0 %3746, %v1390_v27   ;;  %1346 = vrot.lane.b32.xlu1 %v1338_v29, %s4141_s25  ;;  %v2973_v27 = vld [vmem:[%s5233_s24 + $0x68] sm:$0xff] }
 0x49b   : > { %v3539_v29 = vpack.c.bf16 %v2973_v27, %v2972_v23 }
 0x49e   : > { %1375 = vrot.lane.b32.xlu0 %v4591_v18, %s4140_s23  ;;  %1397 = vperm.xlu1 %3747, %v1391_v30   ;;  %v1702_v30 = vld [vmem:[#allocation10 + $0x20] sm:$0xff] }
 0x504   : > { %v1343_v31 = vpop.permute.xlu1 %1342 }
 0x505   : > { %v1351_v32 = vadd.f32 %v1343_v31, %v1190_v49  ;;  %v1357_v49 = vsub.f32 1.0, %v3755_v7  ;;  %v1703_v31 = vld [vmem:[#allocation10 + $0x28] sm:$0xff] }
 0x507   : > { %3760 = vtanh.f32 %v1351_v32 }
 0x508   : > { %v1345_v33 = vpop.permute.xlu0 %1344 }
 0x509   : > { %v1352_v36 = vadd.f32 %v1345_v33, %v1195_v54  ;;  %v1358_v54 = vsub.f32 1.0, %v3757_v14  ;;  %v3545_v33 = vpack.c.bf16 %v1703_v31, %v1702_v30 }
 0x50b   : > { %3762 = vtanh.f32 %v1352_v36 }
 0x50c   : > { %v1347_v39 = vpop.permute.xlu1 %1346 }
 0x50d   : > { %v1353_v43 = vadd.f32 %v1347_v39, %v1200_v59  ;;  %v1704_v39 = vld [vmem:[#allocation10 + $0x30] sm:$0xff] }
 0x50f   : > { %3764 = vtanh.f32 %v1353_v43 }
 0x511   : > { %v3761_v44 = vpop.eup %3760 }
 0x512   : > { %1363 = vrot.lane.b32.xlu0 %v3761_v44, %s4142_s9 }
 0x515   : > { %v3763_v46 = vpop.eup %3762 }
 0x516   : > { %1400 = vperm.xlu0 %3746, %v1392_v45   ;;  %1365 = vrot.lane.b32.xlu1 %v3763_v46, %s4142_s9  ;;  %v3548_v46 = vpack.c.bf16 %v1705_v42, %v1704_v39 }
 0x519   : > { %v3765_v18 = vpop.eup %3764  ;;  %v4767_v47 = vpop.permute.xlu0 %1394 }
 0x51a   : > { %1379 = vrot.lane.b32.xlu0 %v4627_v35, %s4140_s23  ;;  %1377 = vrot.lane.b32.xlu1 %v4607_v26, %s4140_s23  ;;  %vm1402_vm9 = vcmp.eq.s32.totalorder %v4767_v47, 1  ;;  %s5237_s23 = sld [smem:[#allocation33_spill]] }
 0x51d   : > { %v4769_v48 = vpop.permute.xlu0 %1375  ;;  %v4771_v50 = vpop.permute.xlu1 %1397 }
 0x51e   : > { %1367 = vrot.lane.b32.xlu1 %v3765_v18, %s4142_s9  ;;  %v1384_v51 = vmul.f32 %v3755_v7, %v4769_v48  ;;  %vm1403_vm10 = vcmp.eq.s32.totalorder %v4771_v50, 1 }
 0x584   : > { %v1364_v1 = vpop.permute.xlu0 %1363 }
 0x585   : > { %v1372_v52 = vmul.f32 %v1364_v1, %v1357_v49 }
 0x587   : > { %v1387_v53 = vadd.f32 %v1384_v51, %v1372_v52 }
 0x588   : > { %v1366_v35 = vpop.permute.xlu1 %1365 }
 0x589   : > { %v4778_v26 = vsel %vm1402_vm9, %v1387_v53, %v4769_v48  ;;  %v1373_v56 = vmul.f32 %v1366_v35, %v1358_v54 }
 0x58a   : > { %1411 = vrot.lane.b32.xlu1 %v4778_v26, %s4142_s9  ;;  %v1500_v32 = vmul.f32 %v4778_v26, %v4575_v11 }
 0x58c   : > { %v4782_v55 = vpop.permute.xlu1 %1377 }
 0x58d   : > { %v1385_v57 = vmul.f32 %v3757_v14, %v4782_v55  ;;  %v2969_v14 = vld [vmem:[%s5233_s24 + $0x48] sm:$0xff] }
 0x58e   : > { %v3533_v17 = vpack.c.bf16 %v2969_v14, %v2968_v12 }
 0x58f   : > { %v1388_v58 = vadd.f32 %v1385_v57, %v1373_v56 }
 0x590   : > { %v1368_v61 = vpop.permute.xlu1 %1367 }
 0x591   : > { %v4789_v59 = vsel %vm1403_vm10, %v1388_v58, %v4782_v55  ;;  %v1374_v2 = vmul.f32 %v1368_v61, %v1359_v62 }
 0x592   : > { %1413 = vrot.lane.b32.xlu0 %v4789_v59, %s4142_s9  ;;  %v1501_v45 = vmul.f32 %v4789_v59, %v4605_v25 }
 0x595   : > { %v4793_v60 = vpop.permute.xlu0 %1400 }
 0x596   : > { %vm1404_vm11 = vcmp.eq.s32.totalorder %v4793_v60, 1  ;;  %v3012_v60 = vld [vmem:[%s5236_s20] ss:$0 sm:$0xff]  ;;  %s734_s20 = scalar_lea.vmem [#allocation16], %s2935_s5  ;;  %s4044_s5 = sshll.u32 %s4143_s1, 4  ;;  %s4045_s5 = int_to_ptr.vmem [resolvable:$false] %s4044_s5 }
 0x597   : > { %s2743_s19 = sshll.u32 %s734_s20, 4  ;;  %s5120_s19 = int_to_ptr.vmem [resolvable:$true] %s2743_s19 }
 0x598   : > { %s4040_s14 = scalar_lea.vmem %s5120_s19, 64  ;;  %p4047_p8 = scmp.lt.s32.totalorder %s5120_s19, %s4045_s5 }
 0x599   : > { %v4795_v63 = vpop.permute.xlu0 %1379  ;;  %p4041_p7 = scmp.ne.s32.totalorder %s5120_s19, %s4040_s14 }
 0x59a   : > { %v1386_v3 = vmul.f32 %v3759_v22, %v4795_v63  ;;  %v3536_v22 = vpack.c.bf16 %v2971_v21, %v2970_v15 }
 0x59b   : > { %p4042_p1 = pnand %p4041_p7, %p5240_p4 }
 0x59c   : > { %v1389_v4 = vadd.f32 %v1386_v3, %v1374_v2 }
 0x59d   : > { %p4043_p3 = pneg %p4042_p1 }
 0x59e   : > { %v4802_v5 = vsel %vm1404_vm11, %v1389_v4, %v4795_v63  ;;  %v2980_v4 = vld [vmem:[#allocation13 + $0x1] ss:$0 sm:$0xff] }
 0x59f   : > { %1415 = vrot.lane.b32.xlu1 %v4802_v5, %s4142_s9  ;;  %v1502_v51 = vmul.f32 %v4802_v5, %v4624_v34 }
 0x5fc   : > { %v1412_v6 = vpop.permute.xlu1 %1411 }
 0x604   : > { %v1414_v7 = vpop.permute.xlu0 %1413 }
 0x605   : > { %v3518_v8 = vpack.c.bf16 %v1414_v7, %v1412_v6 }
 0x607   : > { %3519 = vmatpush3.bf16.msra.mxu1 %v3518_v8 }
 0x608   : > { %3262 = vmatprep.subr.mxu1 %v4136_v0 }
 0x611   : > { %v1416_v10 = vpop.permute.xlu1 %1415 }
 0x612   : > { %3263 = vmatpush3.msra.mxu1 %v1416_v10 }
 0x613   : > { %3265 = vmatmul.mubr.msk.f32.vlgmr.msra.gmra.mrb[12].mxu1 %vm900_vm3, %v4634_v38  ;;  %3532 = vmatprep.subr.bf16.mxu1 %v4139_v9 }
 0x614   : > { %3267 = vmatprep.mubr.msk.f32.mxu1 %vm4137_vm0, %v4136_v0  ;;  %3534 = vmatpush3.bf16.msra.mxu1 %v3533_v17 }
 0x615   : > { %3535 = vmatprep.subr.bf16.mxu1 %v4139_v9 }
 0x617   : > { %3268 = vmatmul.mubr.msk.f32.gmra.mrb[14].mxu1 %vm900_vm3, %v4647_v40 }
 0x618   : > { %3270 = vmatprep.mubr.msk.f32.mxu1 %vm4137_vm0, %v4136_v0  ;;  %3537 = vmatpush3.bf16.msra.mxu1 %v3536_v22  ;;  %v2976_v22 = vld [vmem:[#allocation11 + $0x1] ss:$0 sm:$0xff] }
 0x619   : > { %3538 = vmatprep.subr.bf16.mxu1 %v4139_v9 }
 0x61b   : > { %3271 = vmatmul.mubr.msk.f32.gmra.mrb[16].mxu1 %vm900_vm3, %v4656_v41 }
 0x61c   : > { %3314 = vmatprep.mubr.msk.f32.mxu1 %vm4137_vm0, %v4136_v0  ;;  %3540 = vmatpush3.bf16.msra.mxu1 %v3539_v29 }
 0x61d   : > { %3541 = vmatprep.subr.bf16.mxu1 %v4139_v9 }
 0x6e6   : > { %v1486_v36 = vpop.f32.mrb[12].mxu1 }
 0x6e7   : > { %v1503_v43 = vsel %vm1005_vm4, %v1486_v36, %v1500_v32  ;;  %v3266_v44 = vpop.f32.mrb[13].mxu1 }
 0x6e8   : > { %3290 = vmatmul.mubr.msk.f32.vlgmr.msra.gmra.mrb[18].mxu0 %vm1009_vm5, %v1503_v43 }
 0x6e9   : > { %3292 = vmatprep.mubr.msk.f32.mxu0 %vm4137_vm0, %v4136_v0  ;;  %3546 = vmatpush3.bf16.msra.mxu0 %v3545_v33 }
 0x6ea   : > { %v1491_v18 = vpop.f32.mrb[14].mxu1  ;;  %3547 = vmatprep.subr.bf16.mxu0 %v4139_v9 }
 0x6eb   : > { %v1504_v49 = vsel %vm1005_vm4, %v1491_v18, %v1501_v45  ;;  %v3269_v1 = vpop.f32.mrb[15].mxu1 }
 0x6ec   : > { %3293 = vmatmul.mubr.msk.f32.gmra.mrb[20].mxu0 %vm1009_vm5, %v1504_v49 }
 0x6ed   : > { %3295 = vmatprep.mubr.msk.f32.mxu0 %vm4137_vm0, %v4136_v0  ;;  %3549 = vmatpush3.bf16.msra.mxu0 %v3548_v46 }
 0x6ee   : > { %v1496_v52 = vpop.f32.mrb[16].mxu1  ;;  %3553 = vmatprep.subr.bf16.mxu0 %v4139_v9 }
 0x6ef   : > { %v1505_v53 = vsel %vm1005_vm4, %v1496_v52, %v1502_v51  ;;  %v3272_v35 = vpop.f32.mrb[17].mxu1 }
 0x6f0   : > { %3296 = vmatmul.mubr.msk.f32.gmra.mrb[22].mxu0 %vm1009_vm5, %v1505_v53 }
 0x6f1   : > { %3331 = vmatprep.mubr.msk.f32.mxu0 %vm4137_vm0, %v4136_v0 }
 0x6f4   : > { %3332 = vmatmul.mubr.msk.f32.vlgmr.msra.gmra.mrb[24].mxu0 %vm1005_vm4, %v1412_v6 }
 0x6f5   : > { %3334 = vmatprep.mubr.msk.f32.mxu0 %vm4137_vm0, %v4136_v0  ;;  %3555 = vmatpush3.bf16.msra.mxu0 %v4586_v16  ;;  %v2974_v16 = vld [vmem:[%s5233_s24 + $0x70] sm:$0xff] }
 0x6f6   : > { %3556 = vmatprep.subr.bf16.mxu0 %v4139_v9 }
 0x6f8   : > { %3335 = vmatmul.mubr.msk.f32.gmra.mrb[26].mxu0 %vm1005_vm4, %v1414_v7 }
 0x6f9   : > { %3337 = vmatprep.mubr.msk.f32.mxu0 %vm4137_vm0, %v4136_v0  ;;  %3558 = vmatpush3.bf16.msra.mxu0 %v4594_v20  ;;  %v2975_v20 = vld [vmem:[%s5233_s24 + $0x78] sm:$0xff] }
 0x6fa   : > { %3559 = vmatprep.subr.bf16.mxu0 %v4139_v9  ;;  %v3542_v54 = vpack.c.bf16 %v2975_v20, %v2974_v16 }
 0x6fc   : > { %3338 = vmatmul.mubr.msk.f32.gmra.mrb[28].mxu0 %vm1005_vm4, %v1416_v10  ;;  %3543 = vmatpush3.bf16.msra.mxu1 %v3542_v54 }
 0x6fd   : > { %3561 = vmatpush3.bf16.msra.mxu0 %v4611_v28  ;;  %3371 = vmatprep.mubr.msk.f32.mxu0 %vm4137_vm0, %v4136_v0 }
 0x6fe   : > { %3562 = vmatprep.subr.bf16.mxu0 %v4139_v9  ;;  %3550 = vmatprep.subr.bf16.mxu1 %v4139_v9 }
 0x701   : > { %3564 = vmatpush3.bf16.msra.mxu0 %v4631_v37 }
 0x702   : > { %3577 = vmatprep.subr.bf16.mxu0 %v4139_v9 }
 0x7bb   : > { %v1581_v28 = vpop.f32.mrb[18].mxu0 }
 0x7bc   : > { %v1582_v56 = vadd.f32 %v1581_v28, %v4725_v13  ;;  %v3291_v57 = vpop.f32.mrb[19].mxu0 }
 0x7be   : > { %3315 = vmatmul.mubr.msk.f32.vlgmr.msra.gmra.mrb[18].mxu1 %vm1009_vm5, %v1582_v56 }
 0x7bf   : > { %v1586_v37 = vpop.f32.mrb[20].mxu0  ;;  %3317 = vmatprep.mubr.msk.f32.mxu1 %vm4137_vm0, %v4136_v0 }
 0x7c0   : > { %v1587_v58 = vadd.f32 %v1586_v37, %v4730_v19  ;;  %v3294_v61 = vpop.f32.mrb[21].mxu0 }
 0x7c2   : > { %3318 = vmatmul.mubr.msk.f32.gmra.mrb[20].mxu1 %vm1009_vm5, %v1587_v58 }
 0x7c3   : > { %v1591_v62 = vpop.f32.mrb[22].mxu0  ;;  %3320 = vmatprep.mubr.msk.f32.mxu1 %vm4137_vm0, %v4136_v0 }
 0x7c4   : > { %v1592_v2 = vadd.f32 %v1591_v62, %v4737_v24  ;;  %v3297_v3 = vpop.f32.mrb[23].mxu0 }
 0x7c6   : > { %3321 = vmatmul.mubr.msk.f32.gmra.mrb[22].mxu1 %vm1009_vm5, %v1592_v2 }
 0x7c7   : > { %v1786_v6 = vpop.f32.mrb[24].mxu0  ;;  %3346 = vmatprep.mubr.msk.f32.mxu1 %vm4137_vm0, %v4136_v0 }
 0x7c8   : > { %v1787_v7 = vadd.f32 %v2980_v4, %v1786_v6  ;;  %v3333_v8 = vpop.f32.mrb[25].mxu0 }
 0x7ca   : > { %1824 = vrot.lane.b32.xlu0 %v1787_v7, %s4141_s25 }
 0x7cb   : > { %v1791_v10 = vpop.f32.mrb[26].mxu0 }
 0x7cc   : > { %v1792_v12 = vadd.f32 %v2980_v4, %v1791_v10  ;;  %v3336_v14 = vpop.f32.mrb[27].mxu0 }
 0x7ce   : > { %1826 = vrot.lane.b32.xlu1 %v1792_v12, %s4141_s25 }
 0x7cf   : > { %v1796_v15 = vpop.f32.mrb[28].mxu0 }
 0x7d0   : > { %v1797_v17 = vadd.f32 %v2980_v4, %v1796_v15  ;;  %v3339_v21 = vpop.f32.mrb[29].mxu0 }
 0x7d2   : > { %1828 = vrot.lane.b32.xlu0 %v1797_v17, %s4141_s25 }
 0x83c   : > { %v1825_v20 = vpop.permute.xlu0 %1824 }
 0x840   : > { %v1827_v56 = vpop.permute.xlu1 %1826 }
 0x844   : > { %v1829_v58 = vpop.permute.xlu0 %1828 }
 0x891   : > { %v1687_v23 = vpop.f32.mrb[18].mxu1 }
 0x892   : > { %v1688_v27 = vadd.f32 %v2976_v22, %v1687_v23  ;;  %v3316_v29 = vpop.f32.mrb[19].mxu1 }
 0x894   : > { %v1800_v30 = vadd.f32 %v1787_v7, %v1688_v27 }
 0x895   : > { %v1692_v31 = vpop.f32.mrb[20].mxu1 }
 0x896   : > { %v2984_v32 = vmul.f32 -1.442695, %v1800_v30  ;;  %v1693_v33 = vadd.f32 %v2976_v22, %v1692_v31  ;;  %v3319_v36 = vpop.f32.mrb[21].mxu1 }
 0x898   : > { %3766 = vpow2.f32 %v2984_v32  ;;  %v1801_v39 = vadd.f32 %v1792_v12, %v1693_v33 }
 0x899   : > { %v1697_v42 = vpop.f32.mrb[22].mxu1 }
 0x89a   : > { %v2985_v43 = vmul.f32 -1.442695, %v1801_v39  ;;  %v1698_v44 = vadd.f32 %v2976_v22, %v1697_v42  ;;  %v3322_v45 = vpop.f32.mrb[23].mxu1 }
 0x89c   : > { %3768 = vpow2.f32 %v2985_v43  ;;  %v1802_v46 = vadd.f32 %v1797_v17, %v1698_v44 }
 0x89e   : > { %v2986_v18 = vmul.f32 -1.442695, %v1802_v46 }
 0x8a0   : > { %3770 = vpow2.f32 %v2986_v18  ;;  %v2994_v18 = vld [vmem:[%s5233_s24 + $0x88] sm:$0xff] }
 0x8a2   : > { %v3767_v49 = vpop.eup %3766 }
 0x8a3   : > { %v1812_v1 = vadd.f32 1.0, %v3767_v49 }
 0x8a5   : > { %3772 = vrcp.f32 %v1812_v1 }
 0x8a6   : > { %v3769_v51 = vpop.eup %3768 }
 0x8a7   : > { %v1813_v52 = vadd.f32 1.0, %v3769_v51  ;;  %v2997_v51 = vld [vmem:[%s5233_s24 + $0xa0] sm:$0xff] }
 0x8a9   : > { %3774 = vrcp.f32 %v1813_v52  ;;  %v2998_v52 = vld [vmem:[%s5233_s24 + $0xa8] sm:$0xff] }
 0x8aa   : > { %v3771_v53 = vpop.eup %3770 }
 0x8ab   : > { %v1814_v35 = vadd.f32 1.0, %v3771_v53  ;;  %v3572_v53 = vpack.c.bf16 %v2998_v52, %v2997_v51 }
 0x8ad   : > { %3776 = vrcp.f32 %v1814_v35  ;;  %v2175_v35 = vld [vmem:[#allocation10 + $0x40] sm:$0xff] }
 0x8af   : > { %v3773_v16 = vpop.eup %3772 }
 0x8b0   : > { %v1833_v54 = vmul.f32 %v3773_v16, %v1825_v20  ;;  %v1854_v14 = vsub.f32 1.0, %v3773_v16  ;;  %v1872_v17 = vmul.f32 %v3773_v16, %v4778_v26  ;;  %v2176_v16 = vld [vmem:[#allocation10 + $0x48] sm:$0xff] }
 0x8b2   : > { %1839 = vrot.lane.b32.xlu1 %v1833_v54, %s4141_s25  ;;  %v3578_v54 = vpack.c.bf16 %v2176_v16, %v2175_v35 }
 0x8b3   : > { %v3775_v28 = vpop.eup %3774 }
 0x8b4   : > { %v1834_v57 = vmul.f32 %v3775_v28, %v1827_v56  ;;  %v1855_v23 = vsub.f32 1.0, %v3775_v28  ;;  %v1873_v29 = vmul.f32 %v3775_v28, %v4789_v59  ;;  %v2177_v56 = vld [vmem:[#allocation10 + $0x50] sm:$0xff] }
 0x8b6   : > { %1841 = vrot.lane.b32.xlu0 %v1834_v57, %s4141_s25  ;;  %v2178_v57 = vld [vmem:[#allocation10 + $0x58] sm:$0xff] }
 0x8b7   : > { %v3777_v37 = vpop.eup %3776 }
 0x8b8   : > { %v1835_v61 = vmul.f32 %v3777_v37, %v1829_v58  ;;  %v1874_v26 = vmul.f32 %v3777_v37, %v4802_v5 }
 0x8ba   : > { %1843 = vrot.lane.b32.xlu1 %v1835_v61, %s4141_s25 }
 0x924   : > { %v1840_v62 = vpop.permute.xlu1 %1839 }
 0x925   : > { %v1848_v2 = vadd.f32 %v1840_v62, %v1688_v27  ;;  %v3581_v62 = vpack.c.bf16 %v2178_v57, %v2177_v56 }
 0x927   : > { %3778 = vtanh.f32 %v1848_v2 }
 0x928   : > { %v1842_v3 = vpop.permute.xlu0 %1841 }
 0x929   : > { %v1849_v4 = vadd.f32 %v1842_v3, %v1693_v33  ;;  %v1856_v33 = vsub.f32 1.0, %v3777_v37 }
 0x92b   : > { %3780 = vtanh.f32 %v1849_v4 }
 0x92c   : > { %v1844_v6 = vpop.permute.xlu1 %1843 }
 0x92d   : > { %v1850_v7 = vadd.f32 %v1844_v6, %v1698_v44 }
 0x92f   : > { %3782 = vtanh.f32 %v1850_v7 }
 0x931   : > { %v3779_v8 = vpop.eup %3778 }
 0x932   : > { %1860 = vrot.lane.b32.xlu0 %v3779_v8, %s4142_s9  ;;  %v3000_v8 = vld [vmem:[%s5233_s24 + $0xb8] sm:$0xff] }
 0x935   : > { %v3781_v10 = vpop.eup %3780 }
 0x936   : > { %1862 = vrot.lane.b32.xlu1 %v3781_v10, %s4142_s9 }
 0x939   : > { %v3783_v12 = vpop.eup %3782 }
 0x93a   : > { %1864 = vrot.lane.b32.xlu0 %v3783_v12, %s4142_s9 }
 0x9a4   : > { %v1861_v15 = vpop.permute.xlu0 %1860 }
 0x9a5   : > { %v1869_v21 = vmul.f32 %v1861_v15, %v1854_v14 }
 0x9a7   : > { %v1875_v22 = vadd.f32 %v1872_v17, %v1869_v21 }
 0x9a8   : > { %v1863_v27 = vpop.permute.xlu1 %1862 }
 0x9a9   : > { %v1870_v30 = vmul.f32 %v1863_v27, %v1855_v23  ;;  %v4911_v31 = vsel %vm1402_vm9, %v1875_v22, %v4769_v48 }
 0x9aa   : > { %1884 = vrot.lane.b32.xlu1 %v4911_v31, %s4142_s9  ;;  %v1973_v20 = vmul.f32 %v4911_v31, %v4575_v11 }
 0x9ab   : > { %v1876_v32 = vadd.f32 %v1873_v29, %v1870_v30  ;;  %v3005_v29 = vld [vmem:[#allocation13 + $0x2] ss:$0 sm:$0xff] }
 0x9ac   : > { %v1865_v36 = vpop.permute.xlu0 %1864 }
 0x9ad   : > { %v1871_v39 = vmul.f32 %v1865_v36, %v1856_v33  ;;  %v4919_v42 = vsel %vm1403_vm10, %v1876_v32, %v4782_v55 }
 0x9ae   : > { %1886 = vrot.lane.b32.xlu0 %v4919_v42, %s4142_s9  ;;  %v1974_v61 = vmul.f32 %v4919_v42, %v4605_v25 }
 0x9af   : > { %v1877_v59 = vadd.f32 %v1874_v26, %v1871_v39  ;;  %v3001_v26 = vld [vmem:[#allocation11 + $0x2] ss:$0 sm:$0xff] }
 0x9b1   : > { %v4926_v43 = vsel %vm1404_vm11, %v1877_v59, %v4795_v63 }
 0x9b2   : > { %1888 = vrot.lane.b32.xlu1 %v4926_v43, %s4142_s9  ;;  %v1975_v4 = vmul.f32 %v4926_v43, %v4624_v34  ;;  %v2999_v34 = vld [vmem:[%s5233_s24 + $0xb0] sm:$0xff] }
 0x9b3   : > { %v3575_v10 = vpack.c.bf16 %v3000_v8, %v2999_v34 }
 0xa1c   : > { %v1885_v44 = vpop.permute.xlu1 %1884 }
 0xa20   : > { %v1887_v5 = vpop.permute.xlu0 %1886 }
 0xa21   : > { %v3551_v45 = vpack.c.bf16 %v1887_v5, %v1885_v44 }
 0xa23   : > { %3552 = vmatpush3.bf16.msra.mxu1 %v3551_v45 }
 0xa24   : > { %3344 = vmatprep.subr.mxu1 %v4136_v0  ;;  %v4931_v46 = vpop.permute.xlu1 %1888 }
 0xa27   : > { %3345 = vmatpush3.msra.mxu1 %v4931_v46 }
 0xa28   : > { %3347 = vmatmul.mubr.msk.f32.vlgmr.msra.gmra.mrb[24].mxu1 %vm900_vm3, %v4634_v38  ;;  %3565 = vmatprep.subr.bf16.mxu1 %v4139_v9  ;;  %v2993_v38 = vld [vmem:[%s5233_s24 + $0x80] sm:$0xff] }
 0xa29   : > { %3349 = vmatprep.mubr.msk.f32.mxu1 %vm4137_vm0, %v4136_v0  ;;  %v3566_v49 = vpack.c.bf16 %v2994_v18, %v2993_v38 }
 0xa2b   : > { %3567 = vmatpush3.bf16.msra.mxu1 %v3566_v49 }
 0xa2c   : > { %3350 = vmatmul.mubr.msk.f32.gmra.mrb[26].mxu1 %vm900_vm3, %v4647_v40  ;;  %v2995_v40 = vld [vmem:[%s5233_s24 + $0x90] sm:$0xff]  ;;  %3568 = vmatprep.subr.bf16.mxu1 %v4139_v9 }
 0xa2d   : > { %3352 = vmatprep.mubr.msk.f32.mxu1 %vm4137_vm0, %v4136_v0 }
 0xa30   : > { %3353 = vmatmul.mubr.msk.f32.gmra.mrb[28].mxu1 %vm900_vm3, %v4656_v41  ;;  %v2996_v41 = vld [vmem:[%s5233_s24 + $0x98] sm:$0xff] }
 0xa31   : > { %3396 = vmatprep.mubr.msk.f32.mxu1 %vm4137_vm0, %v4136_v0  ;;  %v3569_v1 = vpack.c.bf16 %v2996_v41, %v2995_v40 }
 0xa33   : > { %3570 = vmatpush3.bf16.msra.mxu1 %v3569_v1 }
 0xa34   : > { %3571 = vmatprep.subr.bf16.mxu1 %v4139_v9 }
 0xa37   : > { %3573 = vmatpush3.bf16.msra.mxu1 %v3572_v53 }
 0xa38   : > { %3574 = vmatprep.subr.bf16.mxu1 %v4139_v9 }
 0xa3b   : > { %3576 = vmatpush3.bf16.msra.mxu1 %v3575_v10 }
 0xa3c   : > { %3610 = vmatprep.subr.bf16.mxu1 %v4139_v9 }
 0xafb   : > { %v1959_v28 = vpop.f32.mrb[24].mxu1 }
 0xafc   : > { %v1976_v37 = vsel %vm1005_vm4, %v1959_v28, %v1973_v20  ;;  %v3348_v58 = vpop.f32.mrb[25].mxu1 }
 0xafd   : > { %3372 = vmatmul.mubr.msk.f32.vlgmr.msra.gmra.mrb[30].mxu0 %vm1009_vm5, %v1976_v37 }
 0xafe   : > { %3374 = vmatprep.mubr.msk.f32.mxu0 %vm4137_vm0, %v4136_v0  ;;  %3579 = vmatpush3.bf16.msra.mxu0 %v3578_v54 }
 0xaff   : > { %v1964_v2 = vpop.f32.mrb[26].mxu1  ;;  %3580 = vmatprep.subr.bf16.mxu0 %v4139_v9 }
 0xb00   : > { %v1977_v11 = vsel %vm1005_vm4, %v1964_v2, %v1974_v61  ;;  %v3351_v3 = vpop.f32.mrb[27].mxu1 }
 0xb01   : > { %3375 = vmatmul.mubr.msk.f32.gmra.mrb[32].mxu0 %vm1009_vm5, %v1977_v11 }
 0xb02   : > { %3377 = vmatprep.mubr.msk.f32.mxu0 %vm4137_vm0, %v4136_v0  ;;  %3582 = vmatpush3.bf16.msra.mxu0 %v3581_v62 }
 0xb03   : > { %v1969_v25 = vpop.f32.mrb[28].mxu1  ;;  %3589 = vmatprep.subr.bf16.mxu0 %v4139_v9 }
 0xb04   : > { %v1978_v6 = vsel %vm1005_vm4, %v1969_v25, %v1975_v4  ;;  %v3354_v7 = vpop.f32.mrb[29].mxu1 }
 0xb05   : > { %3378 = vmatmul.mubr.msk.f32.gmra.mrb[34].mxu0 %vm1009_vm5, %v1978_v6 }
 0xb06   : > { %3413 = vmatprep.mubr.msk.f32.mxu0 %vm4137_vm0, %v4136_v0 }
 0xb09   : > { %3414 = vmatmul.mubr.msk.f32.vlgmr.msra.gmra.mrb[36].mxu0 %vm1005_vm4, %v1885_v44 }
 0xb0a   : > { %3416 = vmatprep.mubr.msk.f32.mxu0 %vm4137_vm0, %v4136_v0 }
 0xb0d   : > { %3417 = vmatmul.mubr.msk.f32.gmra.mrb[38].mxu0 %vm1005_vm4, %v1887_v5 }
 0xb0e   : > { %3447 = vmatprep.mubr.msk.f32.mxu0 %vm4137_vm0, %v4136_v0 }
 0xbd0   : > { %v2054_v12 = vpop.f32.mrb[30].mxu0 }
 0xbd1   : > { %v2055_v14 = vadd.f32 %v2054_v12, %v4725_v13  ;;  %v3373_v15 = vpop.f32.mrb[31].mxu0 }
 0xbd3   : > { %3397 = vmatmul.mubr.msk.f32.vlgmr.msra.gmra.mrb[30].mxu1 %vm1009_vm5, %v2055_v14 }
 0xbd4   : > { %v2059_v17 = vpop.f32.mrb[32].mxu0  ;;  %3399 = vmatprep.mubr.msk.f32.mxu1 %vm4137_vm0, %v4136_v0  ;;  %3612 = vmatpush3.bf16.msra.mxu1 %v3578_v54 }
 0xbd5   : > { %v2060_v21 = vadd.f32 %v2059_v17, %v4730_v19  ;;  %v3376_v22 = vpop.f32.mrb[33].mxu0  ;;  %3611 = vmatprep.subr.bf16.mxu1 %v4139_v9 }
 0xbd6   : > { %v2354_v22 = vld [vmem:[%s5235_s8] sm:$0xff] }
 0xbd7   : > { %3400 = vmatmul.mubr.msk.f32.gmra.mrb[32].mxu1 %vm1009_vm5, %v2060_v21 }
 0xbd8   : > { %v2064_v23 = vpop.f32.mrb[34].mxu0  ;;  %3402 = vmatprep.mubr.msk.f32.mxu1 %vm4137_vm0, %v4136_v0  ;;  %3613 = vmatpush3.bf16.msra.mxu1 %v3581_v62 }
 0xbd9   : > { %v2065_v13 = vadd.f32 %v2064_v23, %v4737_v24  ;;  %v3379_v27 = vpop.f32.mrb[35].mxu0  ;;  %3583 = vmatprep.subr.bf16.mxu1 %v4139_v9  ;;  %v2355_v23 = vld [vmem:[%s5235_s8 + $0x8] sm:$0xff] }
 0xbda   : > { %v3584_v27 = vpack.c.bf16 %v2355_v23, %v2354_v22 }
 0xbdb   : > { %3403 = vmatmul.mubr.msk.f32.gmra.mrb[34].mxu1 %vm1009_vm5, %v2065_v13  ;;  %v2478_v13 = vld [vmem:[#allocation14] sm:$0xff] }
 0xbdc   : > { %v2259_v30 = vpop.f32.mrb[36].mxu0  ;;  %3419 = vmatprep.mubr.msk.f32.mxu1 %vm4137_vm0, %v4136_v0 }
 0xbdd   : > { %v2260_v19 = vadd.f32 %v3005_v29, %v2259_v30  ;;  %v3415_v32 = vpop.f32.mrb[37].mxu0  ;;  %v2356_v30 = vld [vmem:[%s5235_s8 + $0x10] sm:$0xff] }
 0xbdf   : > { %3420 = vmatmul.mubr.msk.f32.vlgmr.msra.gmra.mrb[36].mxu1 %vm1005_vm4, %v4931_v46  ;;  %2297 = vrot.lane.b32.xlu0 %v2260_v19, %s4141_s25 }
 0xbe0   : > { %v2264_v33 = vpop.f32.mrb[38].mxu0  ;;  %3430 = vmatprep.mubr.msk.f32.mxu1 %vm4137_vm0, %v4136_v0  ;;  %3585 = vmatpush3.bf16.msra.mxu1 %v3584_v27 }
 0xbe1   : > { %v2265_v24 = vadd.f32 %v3005_v29, %v2264_v33  ;;  %v3418_v36 = vpop.f32.mrb[39].mxu0  ;;  %v2480_v33 = vld [vmem:[#allocation14 + $0x10] sm:$0xff]  ;;  %3586 = vmatprep.subr.bf16.mxu1 %v4139_v9 }
 0xbe3   : > { %2299 = vrot.lane.b32.xlu1 %v2265_v24, %s4141_s25 }
 0xc51   : > { %v2298_v57 = vpop.permute.xlu0 %2297 }
 0xc55   : > { %v2300_v61 = vpop.permute.xlu1 %2299 }
 0xca6   : > { %v2160_v39 = vpop.f32.mrb[30].mxu1 }
 0xca7   : > { %v2161_v59 = vadd.f32 %v3001_v26, %v2160_v39  ;;  %v3398_v44 = vpop.f32.mrb[31].mxu1 }
 0xca9   : > { %v2273_v5 = vadd.f32 %v2260_v19, %v2161_v59  ;;  %v2357_v19 = vld [vmem:[%s5235_s8 + $0x18] sm:$0xff] }
 0xcaa   : > { %v2165_v45 = vpop.f32.mrb[32].mxu1  ;;  %v3587_v36 = vpack.c.bf16 %v2357_v19, %v2356_v30 }
 0xcab   : > { %v3009_v38 = vmul.f32 -1.442695, %v2273_v5  ;;  %v2166_v18 = vadd.f32 %v3001_v26, %v2165_v45  ;;  %v3401_v40 = vpop.f32.mrb[33].mxu1 }
 0xcac   : > { %3588 = vmatpush3.bf16.msra.mxu1 %v3587_v36 }
 0xcad   : > { %3784 = vpow2.f32 %v3009_v38  ;;  %v2274_v46 = vadd.f32 %v2265_v24, %v2166_v18  ;;  %v2481_v24 = vld [vmem:[#allocation14 + $0x18] sm:$0xff]  ;;  %3595 = vmatprep.subr.bf16.mxu1 %v4139_v9 }
 0xcae   : > { %v2170_v49 = vpop.f32.mrb[34].mxu1 }
 0xcaf   : > { %v3010_v41 = vmul.f32 -1.442695, %v2274_v46  ;;  %v2171_v1 = vadd.f32 %v3001_v26, %v2170_v49  ;;  %v3404_v51 = vpop.f32.mrb[35].mxu1  ;;  %v3593_v26 = vpack.c.bf16 %v2481_v24, %v2480_v33 }
 0xcb1   : > { %3786 = vpow2.f32 %v3010_v41 }
 0xcb2   : > { %v2269_v52 = vpop.f32.mrb[36].mxu1 }
 0xcb3   : > { %v2270_v53 = vadd.f32 %v3005_v29, %v2269_v52  ;;  %v3421_v35 = vpop.f32.mrb[37].mxu1  ;;  %v2479_v29 = vld [vmem:[#allocation14 + $0x8] sm:$0xff] }
 0xcb4   : > { %v3590_v32 = vpack.c.bf16 %v2479_v29, %v2478_v13 }
 0xcb5   : > { %2301 = vrot.lane.b32.xlu0 %v2270_v53, %s4141_s25  ;;  %v2275_v2 = vadd.f32 %v2270_v53, %v2171_v1 }
 0xcb6   : > { %3591 = vmatpush3.bf16.msra.mxu0 %v3590_v32 }
 0xcb7   : > { %v3785_v16 = vpop.eup %3784  ;;  %v3011_v11 = vmul.f32 -1.442695, %v2275_v2  ;;  %3592 = vmatprep.subr.bf16.mxu0 %v4139_v9  ;;  %v2642_v2 = vld [vmem:[%s5237_s23 + $0x18] sm:$0xff] }
 0xcb8   : > { %v2285_v20 = vadd.f32 1.0, %v3785_v16 }
 0xcba   : > { %3788 = vrcp.f32 %v2285_v20  ;;  %3594 = vmatpush3.bf16.msra.mxu0 %v3593_v26 }
 0xcbb   : > { %v3787_v54 = vpop.eup %3786  ;;  %3598 = vmatprep.subr.bf16.mxu0 %v4139_v9 }
 0xcbc   : > { %v2286_v28 = vadd.f32 1.0, %v3787_v54 }
 0xcbe   : > { %3790 = vrcp.f32 %v2286_v28 }
 0xcbf   : > { %3792 = vpow2.f32 %v3011_v11 }
 0xcc4   : > { %v3789_v56 = vpop.eup %3788 }
 0xcc5   : > { %v2306_v37 = vmul.f32 %v3789_v56, %v2298_v57  ;;  %v2345_v5 = vmul.f32 %v3789_v56, %v4911_v31  ;;  %v2640_v57 = vld [vmem:[%s5237_s23 + $0x8] sm:$0xff] }
 0xcc7   : > { %2312 = vrot.lane.b32.xlu1 %v2306_v37, %s4141_s25  ;;  %v2641_v37 = vld [vmem:[%s5237_s23 + $0x10] sm:$0xff] }
 0xcc8   : > { %v3791_v58 = vpop.eup %3790 }
 0xcc9   : > { %v2307_v62 = vmul.f32 %v3791_v58, %v2300_v61  ;;  %v3793_v3 = vpop.eup %3792  ;;  %v2346_v46 = vmul.f32 %v3791_v58, %v4919_v42 }
 0xcca   : > { %v2287_v4 = vadd.f32 1.0, %v3793_v3 }
 0xccb   : > { %2314 = vrot.lane.b32.xlu0 %v2307_v62, %s4141_s25 }
 0xccc   : > { %3794 = vrcp.f32 %v2287_v4 }
 0xcd6   : > { %v3795_v25 = vpop.eup %3794 }
 0xcd7   : > { %v2329_v31 = vsub.f32 1.0, %v3795_v25  ;;  %v2347_v53 = vmul.f32 %v3795_v25, %v4926_v43 }
 0xd27   : > { %v2302_v6 = vpop.permute.xlu0 %2301 }
 0xd28   : > { %v2308_v7 = vmul.f32 %v3795_v25, %v2302_v6  ;;  %v3602_v25 = vpack.c.bf16 %v2642_v2, %v2641_v37 }
 0xd2a   : > { %2316 = vrot.lane.b32.xlu1 %v2308_v7, %s4141_s25  ;;  %v2643_v7 = vld [vmem:[%s5237_s23 + $0x20] sm:$0xff] }
 0xd39   : > { %v2313_v34 = vpop.permute.xlu1 %2312 }
 0xd3a   : > { %v2321_v8 = vadd.f32 %v2313_v34, %v2161_v59  ;;  %v2327_v59 = vsub.f32 1.0, %v3789_v56  ;;  %v2639_v56 = vld [vmem:[%s5237_s23] sm:$0xff]  ;;  %v2644_v34 = vld [vmem:[%s5237_s23 + $0x28] sm:$0xff] }
 0xd3b   : > { %v3599_v62 = vpack.c.bf16 %v2640_v57, %v2639_v56 }
 0xd3c   : > { %3796 = vtanh.f32 %v2321_v8  ;;  %v3605_v8 = vpack.c.bf16 %v2644_v34, %v2643_v7 }
 0xd3d   : > { %v2315_v10 = vpop.permute.xlu0 %2314 }
 0xd3e   : > { %v2322_v12 = vadd.f32 %v2315_v10, %v2166_v18  ;;  %v2328_v18 = vsub.f32 1.0, %v3791_v58  ;;  %v2645_v10 = vld [vmem:[%s5237_s23 + $0x30] sm:$0xff] }
 0xd40   : > { %3798 = vtanh.f32 %v2322_v12  ;;  %v2646_v12 = vld [vmem:[%s5237_s23 + $0x38] sm:$0xff] }
 0xd46   : > { %v3797_v14 = vpop.eup %3796 }
 0xd47   : > { %2333 = vrot.lane.b32.xlu0 %v3797_v14, %s4142_s9  ;;  %v3608_v14 = vpack.c.bf16 %v2646_v12, %v2645_v10 }
 0xd4a   : > { %v3799_v15 = vpop.eup %3798 }
 0xd4b   : > { %2335 = vrot.lane.b32.xlu1 %v3799_v15, %s4142_s9 }
 0xd9c   : > { %v2317_v17 = vpop.permute.xlu1 %2316 }
 0xd9d   : > { %v2323_v21 = vadd.f32 %v2317_v17, %v2171_v1 }
 0xd9f   : > { %3800 = vtanh.f32 %v2323_v21 }
 0xda9   : > { %v3801_v39 = vpop.eup %3800 }
 0xdaa   : > { %2337 = vrot.lane.b32.xlu0 %v3801_v39, %s4142_s9 }
 0xdb9   : > { %v2334_v44 = vpop.permute.xlu0 %2333 }
 0xdba   : > { %v2342_v45 = vmul.f32 %v2334_v44, %v2327_v59 }
 0xdbc   : > { %v2348_v38 = vadd.f32 %v2345_v5, %v2342_v45  ;;  %v2562_v5 = vld [vmem:[#allocation5] sm:$0xf] }
 0xdbd   : > { %v2336_v40 = vpop.permute.xlu1 %2335 }
 0xdbe   : > { %v2343_v49 = vmul.f32 %v2336_v40, %v2328_v18  ;;  %v2351_v41 = vsel %vm1402_vm9, %v2348_v38, %v4769_v48 }
 0xdbf   : > { %2368 = vrot.lane.b32.xlu1 %v2351_v41, %s4142_s9 }
 0xdc0   : > { %v2349_v1 = vadd.f32 %v2346_v46, %v2343_v49 }
 0xdc2   : > { %v2352_v51 = vsel %vm1403_vm10, %v2349_v1, %v4782_v55 }
 0xdc3   : > { %2370 = vrot.lane.b32.xlu0 %v2352_v51, %s4142_s9 }
 0xe1c   : > { %v2338_v52 = vpop.permute.xlu0 %2337 }
 0xe1d   : > { %v2344_v35 = vmul.f32 %v2338_v52, %v2329_v31 }
 0xe1f   : > { %v2350_v42 = vadd.f32 %v2347_v53, %v2344_v35 }
 0xe21   : > { %v2353_v47 = vsel %vm1404_vm11, %v2350_v42, %v4795_v63 }
 0xe22   : > { %2372 = vrot.lane.b32.xlu1 %v2353_v47, %s4142_s9  ;;  %s5238_s9 = sld [smem:[#allocation34_spill]] }
 0xe28   : > { %v3023_v38 = vld [vmem:[%s5238_s9] ss:$0 sm:$0xff]  ;;  %s4046_s9 = scalar_lea.vmem %s4045_s5, 128 }
 0xe29   : > { %p4048_p6 = scmp.lt.s32.totalorder %s4046_s9, %s4040_s14 }
 0xe2b   : > { %p4049_p0 = por %p4048_p6, %p4047_p8 }
 0xe2d   : > { %p4050_p2 = pnand %p4049_p0, %p4043_p3 }
 0xe31   : > { %v2369_v48 = vpop.permute.xlu1 %2368 }
 0xe32   : > { %3431 = vmatmul.mubr.msk.f32.vlgmr.msra.gmra.mrb[38].mxu1 %vm1005_vm4, %v2369_v48  ;;  %3448 = vmatmul.mubr.msk.f32.vlgmr.msra.gmra.mrb[40].mxu0 %vm1005_vm4, %v2369_v48 }
 0xe33   : > { %3433 = vmatprep.mubr.msk.f32.mxu1 %vm4137_vm0, %v4136_v0  ;;  %3450 = vmatprep.mubr.msk.f32.mxu0 %vm4137_vm0, %v4136_v0 }
 0xe34   : > { %3600 = vmatpush3.bf16.msra.mxu0 %v3599_v62 }
 0xe35   : > { %v2371_v50 = vpop.permute.xlu0 %2370  ;;  %3601 = vmatprep.subr.bf16.mxu0 %v4139_v9 }
 0xe36   : > { %3434 = vmatmul.mubr.msk.f32.gmra.mrb[40].mxu1 %vm1005_vm4, %v2371_v50  ;;  %3451 = vmatmul.mubr.msk.f32.gmra.mrb[42].mxu0 %vm1005_vm4, %v2371_v50 }
 0xe37   : > { %3436 = vmatprep.mubr.msk.f32.mxu1 %vm4137_vm0, %v4136_v0  ;;  %3453 = vmatprep.mubr.msk.f32.mxu0 %vm4137_vm0, %v4136_v0 }
 0xe38   : > { %3603 = vmatpush3.bf16.msra.mxu0 %v3602_v25 }
 0xe39   : > { %3604 = vmatprep.subr.bf16.mxu0 %v4139_v9 }
 0xe3c   : > { %3606 = vmatpush3.bf16.msra.mxu0 %v3605_v8 }
 0xe3d   : > { %3607 = vmatprep.subr.bf16.mxu0 %v4139_v9 }
 0xe40   : > { %3609 = vmatpush3.bf16.msra.mxu0 %v3608_v14 }
 0xe94   : > { %v2373_v55 = vpop.permute.xlu1 %2372 }
 0xe95   : > { %3437 = vmatmul.mubr.msk.f32.gmra.mrb[42].mxu1 %vm1005_vm4, %v2373_v55  ;;  %3454 = vmatmul.mubr.msk.f32.gmra.mrb[44].mxu0 %vm1005_vm4, %v2373_v55 }
 0xe96   : > { %3462 = vmatprep.mubr.msk.f32.mxu1 %vm4137_vm0, %v4136_v0  ;;  %3481 = vmatprep.mubr.msk.f32.mxu0 %vm4137_vm0, %v4136_v0 }
 0xf05   : > { %v2446_v63 = vpop.f32.mrb[38].mxu1  ;;  %v2548_v43 = vpop.f32.mrb[40].mxu0 }
 0xf06   : > { %v2447_v16 = vadd.f32 %v3012_v60, %v2446_v63  ;;  %v3432_v20 = vpop.f32.mrb[39].mxu1  ;;  %v3449_v54 = vpop.f32.mrb[41].mxu0 }
 0xf08   : > { %v3016_v28 = vmul.f32 -1.442695, %v2447_v16 }
 0xf09   : > { %v2451_v58 = vpop.f32.mrb[40].mxu1  ;;  %v2553_v61 = vpop.f32.mrb[42].mxu0 }
 0xf0a   : > { %3802 = vpow2.f32 %v3016_v28  ;;  %v2452_v11 = vadd.f32 %v3012_v60, %v2451_v58  ;;  %v3435_v3 = vpop.f32.mrb[41].mxu1  ;;  %v3452_v4 = vpop.f32.mrb[43].mxu0 }
 0xf0c   : > { %v3017_v6 = vmul.f32 -1.442695, %v2452_v11 }
 0xf0e   : > { %3804 = vpow2.f32 %v3017_v6 }
 0xf14   : > { %v3803_v15 = vpop.eup %3802 }
 0xf15   : > { %v2469_v17 = vadd.f32 1.0, %v3803_v15 }
 0xf17   : > { %3806 = vrcp.f32 %v2469_v17 }
 0xf18   : > { %v3805_v21 = vpop.eup %3804 }
 0xf19   : > { %v2470_v22 = vadd.f32 1.0, %v3805_v21 }
 0xf1b   : > { %3808 = vrcp.f32 %v2470_v22 }
 0xf21   : > { %v3807_v23 = vpop.eup %3806 }
 0xf22   : > { %v2563_v13 = vmul.f32 %v3807_v23, %v2548_v43 }
 0xf25   : > { %v3809_v27 = vpop.eup %3808 }
 0xf26   : > { %v2564_v29 = vmul.f32 %v3809_v27, %v2553_v61 }
 0xf28   : > { %v3596_v30 = vpack.c.bf16 %v2564_v29, %v2563_v13 }
 0xf2a   : > { %3597 = vmatpush3.bf16.msra.mxu1 %v3596_v30 }
 0xf2b   : > { %3460 = vmatprep.subr.mxu1 %v4136_v0 }
 0xf68   : > { %v2456_v19 = vpop.f32.mrb[42].mxu1  ;;  %v2558_v32 = vpop.f32.mrb[44].mxu0 }
 0xf69   : > { %v2457_v33 = vadd.f32 %v3012_v60, %v2456_v19  ;;  %v3438_v24 = vpop.f32.mrb[43].mxu1  ;;  %v3455_v9 = vpop.f32.mrb[45].mxu0 }
 0xf6b   : > { %v3018_v36 = vmul.f32 -1.442695, %v2457_v33 }
 0xf6d   : > { %3810 = vpow2.f32 %v3018_v36 }
 0xf77   : > { %v3811_v26 = vpop.eup %3810 }
 0xf78   : > { %v2471_v39 = vadd.f32 1.0, %v3811_v26 }
 0xf7a   : > { %3812 = vrcp.f32 %v2471_v39 }
 0xf84   : > { %v3813_v59 = vpop.eup %3812 }
 0xf85   : > { %v2565_v44 = vmul.f32 %v3813_v59, %v2558_v32 }
 0xf87   : > { %3461 = vmatpush3.msra.mxu1 %v2565_v44 }
 0xf88   : > { %3463 = vmatmul.mubr.msk.f32.vlgmr.msra.gmra.mrb[44].mxu1 %vm900_vm3, %v2562_v5 }
0x105b   : > { %v2635_v0 = vpop.f32.mrb[44].mxu1 }
0x105c   : > { %v3464_v45 = vpop.f32.mrb[45].mxu1  ;;  %3482 = vmatmul.mubr.msk.f32.vlgmr.msra.gmra.mrb[46].mxu0 %vm1009_vm5, %v2635_v0 }
0x112f   : > { %v2723_v18 = vpop.f32.mrb[46].mxu0 }
0x1130   : > { %v2724_v40 = vadd.f32 %v3023_v38, %v2723_v18  ;;  %v3483_v46 = vpop.f32.mrb[47].mxu0 }
0x1132   : > { %2728 = vst.msk [vmem:[%s734_s20] sm:$0xf] %vm2727_vm12, %v2724_v40 }
0x1133   : > { %4053 = shalt.err (!%p4050_p2)
}
0x1134   : > { %s4054_s22 = scalar_lea.hbm %s5118_s2, 64  ;;  %s4058_s4 = scalar_lea.hbm %s5239_s13, 128 }
0x1135   : > { %p4055_p9 = scmp.ne.s32.totalorder %s5118_s2, %s4054_s22  ;;  %p4059_p11 = scmp.lt.u32.totalorder %s5118_s2, %s5239_s13 }
0x1136   : > { %p4060_p13 = scmp.lt.u32.totalorder %s4058_s4, %s4054_s22  ;;  %p4062_p7 = scmp.lt.u32.totalorder %s4054_s22, %s5118_s2 }
0x1137   : > { %p4056_p10 = pnand %p4055_p9, %p5240_p4 }
0x1138   : > { %p4061_p5 = por %p4060_p13, %p4059_p11 }
0x1139   : > { %p4057_p12 = pneg %p4056_p10 }
0x113a   : > { %p4063_p1 = por %p4062_p7, %p4061_p5 }
0x113c   : > { %p4064_p3 = pnand %p4063_p1, %p4057_p12 }
0x113e   : > { %4067 = shalt.err (!%p4064_p3)
}
0x113f   : > { %3648 = dma.vmem_to_hbm [thread:$0]  (%p5240_p4), %s5120_s19, 64, %s5118_s2, %s2730_s0  }
0x1140 PF: > { %s2755_s14 = sand.u32 1, %s4110_s27   ;;  %p5241_p8 = scmp.ne.s32.totalorder %s5217_s26, 0 }
0x1141   : > { %p5242_p6 = scmp.ge.s32.totalorder %s4122_s30, 2  ;;  %s2756_s5 = scalar_lea.sflag [#allocation4], %s2755_s14 }
0x1143   : > { %p3677_p0 = pnand %p5242_p6, %p5241_p8 }
0x1145   : > { %4105 = dma.done.wait (!%p3677_p0), %s2756_s5, 64  }
0x1146   : > { %4107 = vsyncadd (!%p3677_p0), %s2756_s5, 4294967232  ;;  %p35_p2 = scmp.ge.s32.totalorder %s4440_s21, 4   ;;  %s5243_s27 = smov %s4114_s28 }
0x1147   : > { %s5244_s28 = smov %s4118_s29  ;;  %s5245_s29 = smov %s4452_s17 }
0x1148   : > { %s5246_s30 = smov %s4440_s21  ;;  %37 = sbr.rel (!%p35_p2) target bundleno = 23 (0x17), region = 182 }
0x114f   :  { %2761 = vsyncpa [#allocation3], 1 }
0x1150   :  { %2763 = vsyncpa [#allocation3 + $0x1], 1 }
0x1151   :  { %2764 = vsyncpa [#allocation6], 1 }
0x1152   :  { %2765 = vsyncpa [#allocation9], 1 }
0x1153   :  { %2766 = vsyncpa [#allocation12], 1 }
0x1154   :  { %2767 = vsyncpa [#allocation15], 1 }
0x1155   :  { %2768 = vsyncpa [#allocation4], 1 }
0x1156   :  { %2770 = vsyncpa [#allocation4 + $0x1], 1 }

</bundles_post_ra>
